<compile_context>
chip_gen: v6e
topology: v6e:2x2x1
jax: 0.10.0
libtpu: 0.0.40
codegen_flags: <defaults>
</compile_context>

<pallas_src>
import functools

import jax
import jax.numpy as jnp
import numpy as np
from jax.experimental import pallas as pl
from jax.experimental.pallas import tpu as pltpu

# ---------------------------------------------------------------------------
# Module hyper-parameters (defaults of the PyTorch NeRF module).
# ---------------------------------------------------------------------------
D = 8
W = 256
W_HALF = W // 2                        # 128
FREQS_XYZ = 10
FREQS_DIR = 4
SKIPS = (4,)
C_XYZ = 3 + 3 * FREQS_XYZ * 2          # 63
C_DIR = 3 + 3 * FREQS_DIR * 2          # 27
IN_PAD = 128                           # packed encoding lane width (63+27 <= 128)
OUT_PAD = 128                          # packed output lane width (sigma + rgb)
RAW_W = 8                              # raw kernel input lanes: [xyz(3), dir(3), 0, 0]
EMB_ROWS = 16                          # 6 scale rows + id mask + sin/cos mask + phase
B_TOTAL = 8 * W + W + 128 + 128        # 2560 lanes of concatenated biases
TB_MAX = 1024                          # default max batch tile (sweepable 512-2048)


# ---------------------------------------------------------------------------
# NeRF positional encoding (Embedding module): [x, sin(2^k x), cos(2^k x), ...]
# (used only by the pure-JAX reference; the kernel computes it internally)
# ---------------------------------------------------------------------------
def embed(x, n_freqs):
    outs = [x]
    for k in range(n_freqs):
        f = jnp.float32(2.0 ** k)
        outs.append(jnp.sin(f * x))
        outs.append(jnp.cos(f * x))
    return jnp.concatenate(outs, axis=-1)


# ---------------------------------------------------------------------------
# Pallas kernel: embedding + full MLP hot path (12 MXU matmuls + ReLUs / tile).
# ---------------------------------------------------------------------------
def nerf_kernel(raw_ref, emb_ref, w_in_ref, w_hid_ref, w_fin_ref,
                w_hd_ref, w_sm_ref, b_ref, out_ref):
    f32 = jnp.float32
    bf16 = jnp.bfloat16

    def bias(off, width=W):
        return b_ref[:, off:off + width]                 # (1, width) f32

    def mxu(a, w):
        return jnp.dot(a, w, preferred_element_type=f32)

    # ---- in-kernel positional encoding (VPU/EUP; overlaps the MXU-bound MLP) --
    # arg[lane] = 2^k(lane) * coord(lane).  Each lane has exactly one nonzero
    # scale row, so the broadcast mul-add chain is exact f32.
    raw = raw_ref[...]                                   # (tb, 8) f32
    e = emb_ref[...]                                     # (16, 128) f32
    arg = (raw[:, 0:1] * e[0:1, :] + raw[:, 1:2] * e[1:2, :]
           + raw[:, 2:3] * e[2:3, :] + raw[:, 3:4] * e[3:4, :]
           + raw[:, 4:5] * e[4:5, :] + raw[:, 5:6] * e[5:6, :])
    # identity lanes pass `arg` through; sin lanes use phase 0, cos lanes use
    # phase pi/2 so a single sine pass covers both.  Unused lanes are zero.
    packed = (arg * e[6:7, :]
              + jnp.sin(arg + e[8:9, :]) * e[7:8, :]).astype(bf16)   # (tb, 128)

    def layer(a, w, boff):                               # Linear + ReLU, bf16 out
        return jnp.maximum(mxu(a, w) + bias(boff), 0.0).astype(bf16)

    h = layer(packed, w_in_ref[0], 0 * W)                # xyz_encoding_1
    h = layer(h, w_hid_ref[0], 1 * W)                    # xyz_encoding_2
    h = layer(h, w_hid_ref[1], 2 * W)                    # xyz_encoding_3
    h = layer(h, w_hid_ref[2], 3 * W)                    # xyz_encoding_4
    # xyz_encoding_5 (skip): cat([xenc, h]) @ W5 == xenc @ W5[:63] + h @ W5[63:]
    h = jnp.maximum(mxu(h, w_hid_ref[3]) + mxu(packed, w_in_ref[1]) + bias(4 * W),
                    0.0).astype(bf16)
    h = layer(h, w_hid_ref[4], 5 * W)                    # xyz_encoding_6
    h = layer(h, w_hid_ref[5], 6 * W)                    # xyz_encoding_7
    h = layer(h, w_hid_ref[6], 7 * W)                    # xyz_encoding_8

    # xyz_encoding_final (no activation)
    final = (mxu(h, w_fin_ref[...]) + bias(8 * W)).astype(bf16)       # (tb, 256)

    # dir_encoding: cat([final, viewdir_encoded]) @ Wdir (split matmul) + ReLU
    d = jnp.maximum(mxu(final, w_hd_ref[0]) + mxu(packed, w_sm_ref[0])
                    + bias(9 * W, 128), 0.0).astype(bf16)             # (tb, 128)

    # sigma (output lane 0) and rgb-pre-GELU (lanes 1..3) accumulate directly
    # into the packed bf16 output; no wide f32 head intermediate is kept.
    # TODO(synk): move the exact erf GELU epilogue in here once lax.erf Mosaic
    # lowering is confirmed (only the (B, 3) slice is affected).
    out = mxu(h, w_hd_ref[1]) + mxu(d, w_sm_ref[1]) + bias(9 * W + 128, 128)
    out_ref[...] = out.astype(bf16)


# ---------------------------------------------------------------------------
# Parameter init (deterministic, torch.nn.Linear-style uniform init).
# ---------------------------------------------------------------------------
def init_params(key):
    layer_dims = [
        ('xyz_1', C_XYZ, W), ('xyz_2', W, W), ('xyz_3', W, W), ('xyz_4', W, W),
        ('xyz_5', C_XYZ + W, W),                       # skip layer (i=4)
        ('xyz_6', W, W), ('xyz_7', W, W), ('xyz_8', W, W),
        ('final', W, W), ('sigma', W, 1),
        ('dir', W + C_DIR, W_HALF), ('rgb', W_HALF, 3),
    ]
    params = {}
    for name, fan_in, fan_out in layer_dims:
        key, kw, kb = jax.random.split(key, 3)
        bound = 1.0 / np.sqrt(fan_in)
        w = jax.random.uniform(kw, (fan_in, fan_out), jnp.float32, -bound, bound)
        b = jax.random.uniform(kb, (fan_out,), jnp.float32, -bound, bound)
        params[name] = (w, b)
    return params


def _pad_rows(w, rows, row_offset=0):
    out = jnp.zeros((rows, w.shape[1]), jnp.float32)
    return out.at[row_offset:row_offset + w.shape[0]].set(w)


def build_emb_const():
    """(16,128) f32 constant: rows 0..5 per-coordinate lane scales (2^k),
    row 6 identity mask, row 7 sin/cos mask, row 8 phase (pi/2 on cos lanes)."""
    e = np.zeros((EMB_ROWS, IN_PAD), np.float32)

    def fill(base, n_freqs, coord_base):
        for c in range(3):                               # identity lanes
            e[coord_base + c, base + c] = 1.0
        e[6, base:base + 3] = 1.0
        off = base + 3
        for k in range(n_freqs):
            f = 2.0 ** k
            for c in range(3):
                e[coord_base + c, off + c] = f           # sin lanes
                e[coord_base + c, off + 3 + c] = f       # cos lanes
            e[7, off:off + 6] = 1.0
            e[8, off + 3:off + 6] = np.pi / 2.0
            off += 6

    fill(0, FREQS_XYZ, 0)            # xyz encoding -> lanes 0..62
    fill(C_XYZ, FREQS_DIR, 3)        # viewdir encoding -> lanes 63..89
    return jnp.asarray(e)


def build_kernel_args(params):
    """Pack / pad / stack weights (bf16) + one f32 bias row + embedding const."""
    p = params
    w1, b1 = p['xyz_1']            # (63, 256)
    w2, b2 = p['xyz_2']
    w3, b3 = p['xyz_3']
    w4, b4 = p['xyz_4']
    w5, b5 = p['xyz_5']            # (63+256, 256): rows [:63]->xenc, [63:]->h
    w6, b6 = p['xyz_6']
    w7, b7 = p['xyz_7']
    w8, b8 = p['xyz_8']
    wfin, bfin = p['final']        # (256, 256)
    wsig, bsig = p['sigma']        # (256, 1)
    wdir, bdir = p['dir']          # (256+27, 128): rows [:256]->final, [256:]->denc
    wrgb, brgb = p['rgb']          # (128, 3)

    bf16 = jnp.bfloat16
    emb = build_emb_const()
    # projections from the packed 128-lane encoding (zero rows kill foreign lanes)
    w_in = jnp.stack([_pad_rows(w1, IN_PAD),
                      _pad_rows(w5[:C_XYZ], IN_PAD)]).astype(bf16)    # (2,128,256)
    w_hid = jnp.stack([w2, w3, w4, w5[C_XYZ:], w6, w7, w8]).astype(bf16)  # (7,256,256)
    w_fin = wfin.astype(bf16)                                         # (256,256)
    # sigma weights -> output lane 0; rgb weights -> output lanes 1..3
    w_sig = jnp.zeros((W, OUT_PAD), jnp.float32).at[:, 0:1].set(wsig)
    w_hd = jnp.stack([wdir[:W], w_sig]).astype(bf16)                  # (2,256,128)
    w_dir_b = _pad_rows(wdir[W:], IN_PAD, row_offset=C_XYZ)           # (128,128)
    w_rgb = jnp.zeros((W_HALF, OUT_PAD), jnp.float32).at[:, 1:4].set(wrgb)
    w_sm = jnp.stack([w_dir_b, w_rgb]).astype(bf16)                   # (2,128,128)

    b_out = (jnp.zeros((OUT_PAD,), jnp.float32)
             .at[0:1].set(bsig).at[1:4].set(brgb))
    b_all = jnp.concatenate(
        [b1, b2, b3, b4, b5, b6, b7, b8, bfin, bdir, b_out])[None, :]
    assert b_all.shape == (1, B_TOTAL)
    return [emb, w_in, w_hid, w_fin, w_hd, w_sm, b_all.astype(jnp.float32)]


# ---------------------------------------------------------------------------
# Wrapper: raw coord packing in JAX, encoding + MLP in the Pallas kernel.
# ---------------------------------------------------------------------------
def _round_up(x, m):
    return (x + m - 1) // m * m


def _choose_tb(B, tb_max=TB_MAX):
    """Batch tile: big tiles (amortize per-step pipeline overhead), minimal
    padding, and >=2 tiles once B is large enough so both v7x TCs get work."""
    b16 = _round_up(B, 16)                    # bf16 native (16,128) sublane tiling
    if b16 <= 512:
        return b16                            # single tile, no wasted rows
    n_tiles = max(2, -(-b16 // tb_max))       # ceil-div; at least 2 tiles
    return _round_up(-(-b16 // n_tiles), 16)


def nerf_forward(xyz, viewdir, params, tb_max=TB_MAX):
    B = xyz.shape[0]
    tb = _choose_tb(B, tb_max)
    B_pad = _round_up(B, tb)
    grid = B_pad // tb

    # Only 24 B/sample of raw coords cross HBM; the encoding is done in-kernel.
    raw = jnp.concatenate([xyz.astype(jnp.float32), viewdir.astype(jnp.float32),
                           jnp.zeros((B, RAW_W - 6), jnp.float32)], axis=-1)
    if B_pad != B:
        raw = jnp.pad(raw, ((0, B_pad - B), (0, 0)))

    wargs = build_kernel_args(params)

    in_specs = [pl.BlockSpec((tb, RAW_W), lambda i: (i, 0))] + [
        # TODO(synk): add pipeline_mode=pl.Buffered(1) to these constant-index
        # weight/bias specs once single-buffering support in pallas_call's TPU
        # pipeliner is confirmed (saves ~1.4 MiB VMEM of useless double buffers).
        pl.BlockSpec(a.shape, lambda i, n=a.ndim: (0,) * n) for a in wargs
    ]
    out_specs = pl.BlockSpec((tb, OUT_PAD), lambda i: (i, 0))

    # advisory cost so XLA overlaps the wrapper ops with the custom call
    flops_row = 2 * (2 * IN_PAD * W + 8 * W * W + 2 * W * OUT_PAD
                     + 2 * W_HALF * OUT_PAD)             # ~1.38 MFLOP / sample
    weight_bytes = sum(int(np.prod(a.shape)) * a.dtype.itemsize for a in wargs)
    cost = pl.CostEstimate(
        flops=flops_row * B_pad,
        transcendentals=OUT_PAD * B_pad,
        bytes_accessed=B_pad * (RAW_W * 4 + OUT_PAD * 2) + weight_bytes)

    out = pl.pallas_call(
        nerf_kernel,
        out_shape=jax.ShapeDtypeStruct((B_pad, OUT_PAD), jnp.bfloat16),
        grid_spec=pltpu.PrefetchScalarGridSpec(
            num_scalar_prefetch=0,
            grid=(grid,),                     # parallel batch axis (v7x megacore)
            in_specs=in_specs,
            out_specs=out_specs),
        compiler_params=pltpu.CompilerParams(
            dimension_semantics=("parallel",),
            # ~8 MiB live at tb=1024: plenty of headroom, raises v5e's 16 MiB
            # default and stays well under v7x's 64 MiB physical VMEM.
            vmem_limit_bytes=32 * 1024 * 1024),
        cost_estimate=cost,
    )(raw, *wargs)

    out = out[:B].astype(jnp.float32)
    sigma = out[:, 0:1]                                  # (B, 1)
    rgb_lin = out[:, 1:4]                                # (B, 3)
    # exact (erf-based) GELU, matching torch.nn.GELU() default
    rgb = 0.5 * rgb_lin * (1.0 + jax.scipy.special.erf(
        rgb_lin / jnp.float32(np.sqrt(2.0))))
    return rgb, sigma


# ---------------------------------------------------------------------------
# Pure-JAX reference (mirrors the PyTorch forward) for validation.
# ---------------------------------------------------------------------------
def reference_forward(xyz, viewdir, params):
    dot = functools.partial(jnp.dot, precision=jax.lax.Precision.HIGHEST)
    xenc = embed(xyz, FREQS_XYZ)
    denc = embed(viewdir, FREQS_DIR)
    h = xenc
    for i in range(D):
        if i in SKIPS:
            h = jnp.concatenate([xenc, h], axis=-1)
        w, b = params[f'xyz_{i + 1}']
        h = jnp.maximum(dot(h, w) + b, 0.0)
    w, b = params['sigma']
    sigma = dot(h, w) + b
    w, b = params['final']
    final = dot(h, w) + b
    din = jnp.concatenate([final, denc], axis=-1)
    w, b = params['dir']
    dh = jnp.maximum(dot(din, w) + b, 0.0)
    w, b = params['rgb']
    rgb_lin = dot(dh, w) + b
    rgb = 0.5 * rgb_lin * (1.0 + jax.scipy.special.erf(
        rgb_lin / jnp.float32(np.sqrt(2.0))))
    return rgb, sigma


if __name__ == "__main__":
    key = jax.random.PRNGKey(0)
    kp, kx, kd = jax.random.split(key, 3)
    params = init_params(kp)
    fwd = jax.jit(nerf_forward)

    # small smoke test (single 16-row tile)
    B = 8
    xyz = jax.random.normal(kx, (B, 3), jnp.float32)
    viewdir = jax.random.normal(kd, (B, 3), jnp.float32)
    viewdir = viewdir / jnp.linalg.norm(viewdir, axis=-1, keepdims=True)

    rgb, sigma = fwd(xyz, viewdir, params)
    jax.block_until_ready((rgb, sigma))
    rgb_ref, sigma_ref = reference_forward(xyz, viewdir, params)
    np.testing.assert_allclose(np.asarray(rgb), np.asarray(rgb_ref),
                               rtol=2.5e-2, atol=2.5e-2)
    np.testing.assert_allclose(np.asarray(sigma), np.asarray(sigma_ref),
                               rtol=2.5e-2, atol=2.5e-2)
    assert rgb.shape == (B, 3) and sigma.shape == (B, 1)

    # batch=600: exercises padding (600 -> 608) and a 2-tile parallel grid
    B2 = 600
    kx2, kd2 = jax.random.split(jax.random.PRNGKey(1))
    xyz2 = jax.random.normal(kx2, (B2, 3), jnp.float32)
    vd2 = jax.random.normal(kd2, (B2, 3), jnp.float32)
    vd2 = vd2 / jnp.linalg.norm(vd2, axis=-1, keepdims=True)

    rgb2, sigma2 = fwd(xyz2, vd2, params)
    jax.block_until_ready((rgb2, sigma2))
    rgb2_ref, sigma2_ref = reference_forward(xyz2, vd2, params)
    np.testing.assert_allclose(np.asarray(rgb2), np.asarray(rgb2_ref),
                               rtol=2.5e-2, atol=2.5e-2)
    np.testing.assert_allclose(np.asarray(sigma2), np.asarray(sigma2_ref),
                               rtol=2.5e-2, atol=2.5e-2)
    assert rgb2.shape == (B2, 3) and sigma2.shape == (B2, 1)

    print("KERNEL_OK")
</pallas_src>

<mosaic_0001>
module attributes {stable_mosaic.version = 11 : i64} {
  func.func @nerf_kernel(%arg0: i32, %arg1: memref<16x8xf32, #tpu.memory_space<vmem>>, %arg2: memref<16x128xf32, #tpu.memory_space<vmem>>, %arg3: memref<2x128x256xbf16, #tpu.memory_space<vmem>>, %arg4: memref<7x256x256xbf16, #tpu.memory_space<vmem>>, %arg5: memref<256x256xbf16, #tpu.memory_space<vmem>>, %arg6: memref<2x256x128xbf16, #tpu.memory_space<vmem>>, %arg7: memref<2x128x128xbf16, #tpu.memory_space<vmem>>, %arg8: memref<1x2560xf32, #tpu.memory_space<vmem>>, %arg9: memref<16x128xbf16, #tpu.memory_space<vmem>>) attributes {dimension_semantics = [#tpu.dimension_semantics<parallel>], iteration_bounds = array<i64: 1>, scalar_prefetch = 0 : i64, scratch_operands = 0 : i64, tpu.core_type = #tpu.core_type<tc>, window_params = [{transform_indices = @transform_0, window_bounds = array<i64: 16, 8>}, {pipeline_mode = #tpu.pipeline_mode<synchronous>, transform_indices = @transform_1, window_bounds = array<i64: 16, 128>}, {pipeline_mode = #tpu.pipeline_mode<synchronous>, transform_indices = @transform_2, window_bounds = array<i64: 2, 128, 256>}, {pipeline_mode = #tpu.pipeline_mode<synchronous>, transform_indices = @transform_3, window_bounds = array<i64: 7, 256, 256>}, {pipeline_mode = #tpu.pipeline_mode<synchronous>, transform_indices = @transform_4, window_bounds = array<i64: 256, 256>}, {pipeline_mode = #tpu.pipeline_mode<synchronous>, transform_indices = @transform_5, window_bounds = array<i64: 2, 256, 128>}, {pipeline_mode = #tpu.pipeline_mode<synchronous>, transform_indices = @transform_6, window_bounds = array<i64: 2, 128, 128>}, {pipeline_mode = #tpu.pipeline_mode<synchronous>, transform_indices = @transform_7, window_bounds = array<i64: 1, 2560>}, {transform_indices = @transform_8, window_bounds = array<i64: 16, 128>}]} {
    %c0 = arith.constant 0 : index
    %c0_0 = arith.constant 0 : index
    %0 = vector.load %arg1[%c0, %c0_0] : memref<16x8xf32, #tpu.memory_space<vmem>>, vector<16x8xf32>
    %c0_1 = arith.constant 0 : index
    %c0_2 = arith.constant 0 : index
    %1 = vector.load %arg2[%c0_1, %c0_2] : memref<16x128xf32, #tpu.memory_space<vmem>>, vector<16x128xf32>
    %2 = vector.extract_strided_slice %0 {offsets = [0, 0], sizes = [16, 1], strides = [1, 1]} : vector<16x8xf32> to vector<16x1xf32>
    %3 = vector.extract_strided_slice %1 {offsets = [0, 0], sizes = [1, 128], strides = [1, 1]} : vector<16x128xf32> to vector<1x128xf32>
    %4 = vector.broadcast %2 : vector<16x1xf32> to vector<16x128xf32>
    %5 = vector.broadcast %3 : vector<1x128xf32> to vector<16x128xf32>
    %6 = arith.mulf %4, %5 : vector<16x128xf32>
    %7 = vector.extract_strided_slice %0 {offsets = [0, 1], sizes = [16, 1], strides = [1, 1]} : vector<16x8xf32> to vector<16x1xf32>
    %8 = vector.extract_strided_slice %1 {offsets = [1, 0], sizes = [1, 128], strides = [1, 1]} : vector<16x128xf32> to vector<1x128xf32>
    %9 = vector.broadcast %7 : vector<16x1xf32> to vector<16x128xf32>
    %10 = vector.broadcast %8 : vector<1x128xf32> to vector<16x128xf32>
    %11 = arith.mulf %9, %10 : vector<16x128xf32>
    %12 = arith.addf %6, %11 : vector<16x128xf32>
    %13 = vector.extract_strided_slice %0 {offsets = [0, 2], sizes = [16, 1], strides = [1, 1]} : vector<16x8xf32> to vector<16x1xf32>
    %14 = vector.extract_strided_slice %1 {offsets = [2, 0], sizes = [1, 128], strides = [1, 1]} : vector<16x128xf32> to vector<1x128xf32>
    %15 = vector.broadcast %13 : vector<16x1xf32> to vector<16x128xf32>
    %16 = vector.broadcast %14 : vector<1x128xf32> to vector<16x128xf32>
    %17 = arith.mulf %15, %16 : vector<16x128xf32>
    %18 = arith.addf %12, %17 : vector<16x128xf32>
    %19 = vector.extract_strided_slice %0 {offsets = [0, 3], sizes = [16, 1], strides = [1, 1]} : vector<16x8xf32> to vector<16x1xf32>
    %20 = vector.extract_strided_slice %1 {offsets = [3, 0], sizes = [1, 128], strides = [1, 1]} : vector<16x128xf32> to vector<1x128xf32>
    %21 = vector.broadcast %19 : vector<16x1xf32> to vector<16x128xf32>
    %22 = vector.broadcast %20 : vector<1x128xf32> to vector<16x128xf32>
    %23 = arith.mulf %21, %22 : vector<16x128xf32>
    %24 = arith.addf %18, %23 : vector<16x128xf32>
    %25 = vector.extract_strided_slice %0 {offsets = [0, 4], sizes = [16, 1], strides = [1, 1]} : vector<16x8xf32> to vector<16x1xf32>
    %26 = vector.extract_strided_slice %1 {offsets = [4, 0], sizes = [1, 128], strides = [1, 1]} : vector<16x128xf32> to vector<1x128xf32>
    %27 = vector.broadcast %25 : vector<16x1xf32> to vector<16x128xf32>
    %28 = vector.broadcast %26 : vector<1x128xf32> to vector<16x128xf32>
    %29 = arith.mulf %27, %28 : vector<16x128xf32>
    %30 = arith.addf %24, %29 : vector<16x128xf32>
    %31 = vector.extract_strided_slice %0 {offsets = [0, 5], sizes = [16, 1], strides = [1, 1]} : vector<16x8xf32> to vector<16x1xf32>
    %32 = vector.extract_strided_slice %1 {offsets = [5, 0], sizes = [1, 128], strides = [1, 1]} : vector<16x128xf32> to vector<1x128xf32>
    %33 = vector.broadcast %31 : vector<16x1xf32> to vector<16x128xf32>
    %34 = vector.broadcast %32 : vector<1x128xf32> to vector<16x128xf32>
    %35 = arith.mulf %33, %34 : vector<16x128xf32>
    %36 = arith.addf %30, %35 : vector<16x128xf32>
    %37 = vector.extract_strided_slice %1 {offsets = [6, 0], sizes = [1, 128], strides = [1, 1]} : vector<16x128xf32> to vector<1x128xf32>
    %38 = vector.broadcast %37 : vector<1x128xf32> to vector<16x128xf32>
    %39 = arith.mulf %36, %38 : vector<16x128xf32>
    %40 = vector.extract_strided_slice %1 {offsets = [8, 0], sizes = [1, 128], strides = [1, 1]} : vector<16x128xf32> to vector<1x128xf32>
    %41 = vector.broadcast %40 : vector<1x128xf32> to vector<16x128xf32>
    %42 = arith.addf %36, %41 : vector<16x128xf32>
    %43 = math.sin %42 : vector<16x128xf32>
    %44 = vector.extract_strided_slice %1 {offsets = [7, 0], sizes = [1, 128], strides = [1, 1]} : vector<16x128xf32> to vector<1x128xf32>
    %45 = vector.broadcast %44 : vector<1x128xf32> to vector<16x128xf32>
    %46 = arith.mulf %43, %45 : vector<16x128xf32>
    %47 = arith.addf %39, %46 : vector<16x128xf32>
    %48 = arith.truncf %47 : vector<16x128xf32> to vector<16x128xbf16>
    %c0_3 = arith.constant 0 : index
    %c0_4 = arith.constant 0 : index
    %c0_5 = arith.constant 0 : index
    %49 = vector.load %arg3[%c0_3, %c0_4, %c0_5] : memref<2x128x256xbf16, #tpu.memory_space<vmem>>, vector<1x128x256xbf16>
    %50 = vector.shape_cast %49 : vector<1x128x256xbf16> to vector<128x256xbf16>
    %cst = arith.constant dense<0.000000e+00> : vector<16x256xf32>
    %51 = tpu.matmul %48, %50, %cst {dimension_numbers = #tpu.dot_dimension_numbers<[1], [0], [0], [1], [0, 0, 1, 1], [], []>} : vector<16x128xbf16>, vector<128x256xbf16>, vector<16x256xf32> -> vector<16x256xf32>
    %c0_6 = arith.constant 0 : index
    %c0_7 = arith.constant 0 : index
    %52 = vector.load %arg8[%c0_6, %c0_7] : memref<1x2560xf32, #tpu.memory_space<vmem>>, vector<1x256xf32>
    %53 = vector.broadcast %52 : vector<1x256xf32> to vector<16x256xf32>
    %54 = arith.addf %51, %53 : vector<16x256xf32>
    %cst_8 = arith.constant 0.000000e+00 : f32
    %55 = vector.broadcast %cst_8 : f32 to vector<16x256xf32>
    %56 = arith.maximumf %54, %55 : vector<16x256xf32>
    %57 = arith.truncf %56 : vector<16x256xf32> to vector<16x256xbf16>
    %c0_9 = arith.constant 0 : index
    %c0_10 = arith.constant 0 : index
    %c0_11 = arith.constant 0 : index
    %58 = vector.load %arg4[%c0_9, %c0_10, %c0_11] : memref<7x256x256xbf16, #tpu.memory_space<vmem>>, vector<1x256x256xbf16>
    %59 = vector.shape_cast %58 : vector<1x256x256xbf16> to vector<256x256xbf16>
    %cst_12 = arith.constant dense<0.000000e+00> : vector<16x256xf32>
    %60 = tpu.matmul %57, %59, %cst_12 {dimension_numbers = #tpu.dot_dimension_numbers<[1], [0], [0], [1], [0, 0, 1, 1], [], []>} : vector<16x256xbf16>, vector<256x256xbf16>, vector<16x256xf32> -> vector<16x256xf32>
    %c0_13 = arith.constant 0 : index
    %c256 = arith.constant 256 : index
    %61 = vector.load %arg8[%c0_13, %c256] : memref<1x2560xf32, #tpu.memory_space<vmem>>, vector<1x256xf32>
    %62 = vector.broadcast %61 : vector<1x256xf32> to vector<16x256xf32>
    %63 = arith.addf %60, %62 : vector<16x256xf32>
    %cst_14 = arith.constant 0.000000e+00 : f32
    %64 = vector.broadcast %cst_14 : f32 to vector<16x256xf32>
    %65 = arith.maximumf %63, %64 : vector<16x256xf32>
    %66 = arith.truncf %65 : vector<16x256xf32> to vector<16x256xbf16>
    %c1 = arith.constant 1 : index
    %c0_15 = arith.constant 0 : index
    %c0_16 = arith.constant 0 : index
    %67 = vector.load %arg4[%c1, %c0_15, %c0_16] : memref<7x256x256xbf16, #tpu.memory_space<vmem>>, vector<1x256x256xbf16>
    %68 = vector.shape_cast %67 : vector<1x256x256xbf16> to vector<256x256xbf16>
    %cst_17 = arith.constant dense<0.000000e+00> : vector<16x256xf32>
    %69 = tpu.matmul %66, %68, %cst_17 {dimension_numbers = #tpu.dot_dimension_numbers<[1], [0], [0], [1], [0, 0, 1, 1], [], []>} : vector<16x256xbf16>, vector<256x256xbf16>, vector<16x256xf32> -> vector<16x256xf32>
    %c0_18 = arith.constant 0 : index
    %c512 = arith.constant 512 : index
    %70 = vector.load %arg8[%c0_18, %c512] : memref<1x2560xf32, #tpu.memory_space<vmem>>, vector<1x256xf32>
    %71 = vector.broadcast %70 : vector<1x256xf32> to vector<16x256xf32>
    %72 = arith.addf %69, %71 : vector<16x256xf32>
    %cst_19 = arith.constant 0.000000e+00 : f32
    %73 = vector.broadcast %cst_19 : f32 to vector<16x256xf32>
    %74 = arith.maximumf %72, %73 : vector<16x256xf32>
    %75 = arith.truncf %74 : vector<16x256xf32> to vector<16x256xbf16>
    %c2 = arith.constant 2 : index
    %c0_20 = arith.constant 0 : index
    %c0_21 = arith.constant 0 : index
    %76 = vector.load %arg4[%c2, %c0_20, %c0_21] : memref<7x256x256xbf16, #tpu.memory_space<vmem>>, vector<1x256x256xbf16>
    %77 = vector.shape_cast %76 : vector<1x256x256xbf16> to vector<256x256xbf16>
    %cst_22 = arith.constant dense<0.000000e+00> : vector<16x256xf32>
    %78 = tpu.matmul %75, %77, %cst_22 {dimension_numbers = #tpu.dot_dimension_numbers<[1], [0], [0], [1], [0, 0, 1, 1], [], []>} : vector<16x256xbf16>, vector<256x256xbf16>, vector<16x256xf32> -> vector<16x256xf32>
    %c0_23 = arith.constant 0 : index
    %c768 = arith.constant 768 : index
    %79 = vector.load %arg8[%c0_23, %c768] : memref<1x2560xf32, #tpu.memory_space<vmem>>, vector<1x256xf32>
    %80 = vector.broadcast %79 : vector<1x256xf32> to vector<16x256xf32>
    %81 = arith.addf %78, %80 : vector<16x256xf32>
    %cst_24 = arith.constant 0.000000e+00 : f32
    %82 = vector.broadcast %cst_24 : f32 to vector<16x256xf32>
    %83 = arith.maximumf %81, %82 : vector<16x256xf32>
    %84 = arith.truncf %83 : vector<16x256xf32> to vector<16x256xbf16>
    %c3 = arith.constant 3 : index
    %c0_25 = arith.constant 0 : index
    %c0_26 = arith.constant 0 : index
    %85 = vector.load %arg4[%c3, %c0_25, %c0_26] : memref<7x256x256xbf16, #tpu.memory_space<vmem>>, vector<1x256x256xbf16>
    %86 = vector.shape_cast %85 : vector<1x256x256xbf16> to vector<256x256xbf16>
    %cst_27 = arith.constant dense<0.000000e+00> : vector<16x256xf32>
    %87 = tpu.matmul %84, %86, %cst_27 {dimension_numbers = #tpu.dot_dimension_numbers<[1], [0], [0], [1], [0, 0, 1, 1], [], []>} : vector<16x256xbf16>, vector<256x256xbf16>, vector<16x256xf32> -> vector<16x256xf32>
    %c1_28 = arith.constant 1 : index
    %c0_29 = arith.constant 0 : index
    %c0_30 = arith.constant 0 : index
    %88 = vector.load %arg3[%c1_28, %c0_29, %c0_30] : memref<2x128x256xbf16, #tpu.memory_space<vmem>>, vector<1x128x256xbf16>
    %89 = vector.shape_cast %88 : vector<1x128x256xbf16> to vector<128x256xbf16>
    %cst_31 = arith.constant dense<0.000000e+00> : vector<16x256xf32>
    %90 = tpu.matmul %48, %89, %cst_31 {dimension_numbers = #tpu.dot_dimension_numbers<[1], [0], [0], [1], [0, 0, 1, 1], [], []>} : vector<16x128xbf16>, vector<128x256xbf16>, vector<16x256xf32> -> vector<16x256xf32>
    %91 = arith.addf %87, %90 : vector<16x256xf32>
    %c0_32 = arith.constant 0 : index
    %c1024 = arith.constant 1024 : index
    %92 = vector.load %arg8[%c0_32, %c1024] : memref<1x2560xf32, #tpu.memory_space<vmem>>, vector<1x256xf32>
    %93 = vector.broadcast %92 : vector<1x256xf32> to vector<16x256xf32>
    %94 = arith.addf %91, %93 : vector<16x256xf32>
    %cst_33 = arith.constant 0.000000e+00 : f32
    %95 = vector.broadcast %cst_33 : f32 to vector<16x256xf32>
    %96 = arith.maximumf %94, %95 : vector<16x256xf32>
    %97 = arith.truncf %96 : vector<16x256xf32> to vector<16x256xbf16>
    %c4 = arith.constant 4 : index
    %c0_34 = arith.constant 0 : index
    %c0_35 = arith.constant 0 : index
    %98 = vector.load %arg4[%c4, %c0_34, %c0_35] : memref<7x256x256xbf16, #tpu.memory_space<vmem>>, vector<1x256x256xbf16>
    %99 = vector.shape_cast %98 : vector<1x256x256xbf16> to vector<256x256xbf16>
    %cst_36 = arith.constant dense<0.000000e+00> : vector<16x256xf32>
    %100 = tpu.matmul %97, %99, %cst_36 {dimension_numbers = #tpu.dot_dimension_numbers<[1], [0], [0], [1], [0, 0, 1, 1], [], []>} : vector<16x256xbf16>, vector<256x256xbf16>, vector<16x256xf32> -> vector<16x256xf32>
    %c0_37 = arith.constant 0 : index
    %c1280 = arith.constant 1280 : index
    %101 = vector.load %arg8[%c0_37, %c1280] : memref<1x2560xf32, #tpu.memory_space<vmem>>, vector<1x256xf32>
    %102 = vector.broadcast %101 : vector<1x256xf32> to vector<16x256xf32>
    %103 = arith.addf %100, %102 : vector<16x256xf32>
    %cst_38 = arith.constant 0.000000e+00 : f32
    %104 = vector.broadcast %cst_38 : f32 to vector<16x256xf32>
    %105 = arith.maximumf %103, %104 : vector<16x256xf32>
    %106 = arith.truncf %105 : vector<16x256xf32> to vector<16x256xbf16>
    %c5 = arith.constant 5 : index
    %c0_39 = arith.constant 0 : index
    %c0_40 = arith.constant 0 : index
    %107 = vector.load %arg4[%c5, %c0_39, %c0_40] : memref<7x256x256xbf16, #tpu.memory_space<vmem>>, vector<1x256x256xbf16>
    %108 = vector.shape_cast %107 : vector<1x256x256xbf16> to vector<256x256xbf16>
    %cst_41 = arith.constant dense<0.000000e+00> : vector<16x256xf32>
    %109 = tpu.matmul %106, %108, %cst_41 {dimension_numbers = #tpu.dot_dimension_numbers<[1], [0], [0], [1], [0, 0, 1, 1], [], []>} : vector<16x256xbf16>, vector<256x256xbf16>, vector<16x256xf32> -> vector<16x256xf32>
    %c0_42 = arith.constant 0 : index
    %c1536 = arith.constant 1536 : index
    %110 = vector.load %arg8[%c0_42, %c1536] : memref<1x2560xf32, #tpu.memory_space<vmem>>, vector<1x256xf32>
    %111 = vector.broadcast %110 : vector<1x256xf32> to vector<16x256xf32>
    %112 = arith.addf %109, %111 : vector<16x256xf32>
    %cst_43 = arith.constant 0.000000e+00 : f32
    %113 = vector.broadcast %cst_43 : f32 to vector<16x256xf32>
    %114 = arith.maximumf %112, %113 : vector<16x256xf32>
    %115 = arith.truncf %114 : vector<16x256xf32> to vector<16x256xbf16>
    %c6 = arith.constant 6 : index
    %c0_44 = arith.constant 0 : index
    %c0_45 = arith.constant 0 : index
    %116 = vector.load %arg4[%c6, %c0_44, %c0_45] : memref<7x256x256xbf16, #tpu.memory_space<vmem>>, vector<1x256x256xbf16>
    %117 = vector.shape_cast %116 : vector<1x256x256xbf16> to vector<256x256xbf16>
    %cst_46 = arith.constant dense<0.000000e+00> : vector<16x256xf32>
    %118 = tpu.matmul %115, %117, %cst_46 {dimension_numbers = #tpu.dot_dimension_numbers<[1], [0], [0], [1], [0, 0, 1, 1], [], []>} : vector<16x256xbf16>, vector<256x256xbf16>, vector<16x256xf32> -> vector<16x256xf32>
    %c0_47 = arith.constant 0 : index
    %c1792 = arith.constant 1792 : index
    %119 = vector.load %arg8[%c0_47, %c1792] : memref<1x2560xf32, #tpu.memory_space<vmem>>, vector<1x256xf32>
    %120 = vector.broadcast %119 : vector<1x256xf32> to vector<16x256xf32>
    %121 = arith.addf %118, %120 : vector<16x256xf32>
    %cst_48 = arith.constant 0.000000e+00 : f32
    %122 = vector.broadcast %cst_48 : f32 to vector<16x256xf32>
    %123 = arith.maximumf %121, %122 : vector<16x256xf32>
    %124 = arith.truncf %123 : vector<16x256xf32> to vector<16x256xbf16>
    %c0_49 = arith.constant 0 : index
    %c0_50 = arith.constant 0 : index
    %125 = vector.load %arg5[%c0_49, %c0_50] : memref<256x256xbf16, #tpu.memory_space<vmem>>, vector<256x256xbf16>
    %cst_51 = arith.constant dense<0.000000e+00> : vector<16x256xf32>
    %126 = tpu.matmul %124, %125, %cst_51 {dimension_numbers = #tpu.dot_dimension_numbers<[1], [0], [0], [1], [0, 0, 1, 1], [], []>} : vector<16x256xbf16>, vector<256x256xbf16>, vector<16x256xf32> -> vector<16x256xf32>
    %c0_52 = arith.constant 0 : index
    %c2048 = arith.constant 2048 : index
    %127 = vector.load %arg8[%c0_52, %c2048] : memref<1x2560xf32, #tpu.memory_space<vmem>>, vector<1x256xf32>
    %128 = vector.broadcast %127 : vector<1x256xf32> to vector<16x256xf32>
    %129 = arith.addf %126, %128 : vector<16x256xf32>
    %130 = arith.truncf %129 : vector<16x256xf32> to vector<16x256xbf16>
    %c0_53 = arith.constant 0 : index
    %c0_54 = arith.constant 0 : index
    %c0_55 = arith.constant 0 : index
    %131 = vector.load %arg6[%c0_53, %c0_54, %c0_55] : memref<2x256x128xbf16, #tpu.memory_space<vmem>>, vector<1x256x128xbf16>
    %132 = vector.shape_cast %131 : vector<1x256x128xbf16> to vector<256x128xbf16>
    %cst_56 = arith.constant dense<0.000000e+00> : vector<16x128xf32>
    %133 = tpu.matmul %130, %132, %cst_56 {dimension_numbers = #tpu.dot_dimension_numbers<[1], [0], [0], [1], [0, 0, 1, 1], [], []>} : vector<16x256xbf16>, vector<256x128xbf16>, vector<16x128xf32> -> vector<16x128xf32>
    %c0_57 = arith.constant 0 : index
    %c0_58 = arith.constant 0 : index
    %c0_59 = arith.constant 0 : index
    %134 = vector.load %arg7[%c0_57, %c0_58, %c0_59] : memref<2x128x128xbf16, #tpu.memory_space<vmem>>, vector<1x128x128xbf16>
    %135 = vector.shape_cast %134 : vector<1x128x128xbf16> to vector<128x128xbf16>
    %cst_60 = arith.constant dense<0.000000e+00> : vector<16x128xf32>
    %136 = tpu.matmul %48, %135, %cst_60 {dimension_numbers = #tpu.dot_dimension_numbers<[1], [0], [0], [1], [0, 0, 1, 1], [], []>} : vector<16x128xbf16>, vector<128x128xbf16>, vector<16x128xf32> -> vector<16x128xf32>
    %137 = arith.addf %133, %136 : vector<16x128xf32>
    %c0_61 = arith.constant 0 : index
    %c2304 = arith.constant 2304 : index
    %138 = vector.load %arg8[%c0_61, %c2304] : memref<1x2560xf32, #tpu.memory_space<vmem>>, vector<1x128xf32>
    %139 = vector.broadcast %138 : vector<1x128xf32> to vector<16x128xf32>
    %140 = arith.addf %137, %139 : vector<16x128xf32>
    %cst_62 = arith.constant 0.000000e+00 : f32
    %141 = vector.broadcast %cst_62 : f32 to vector<16x128xf32>
    %142 = arith.maximumf %140, %141 : vector<16x128xf32>
    %143 = arith.truncf %142 : vector<16x128xf32> to vector<16x128xbf16>
    %c1_63 = arith.constant 1 : index
    %c0_64 = arith.constant 0 : index
    %c0_65 = arith.constant 0 : index
    %144 = vector.load %arg6[%c1_63, %c0_64, %c0_65] : memref<2x256x128xbf16, #tpu.memory_space<vmem>>, vector<1x256x128xbf16>
    %145 = vector.shape_cast %144 : vector<1x256x128xbf16> to vector<256x128xbf16>
    %cst_66 = arith.constant dense<0.000000e+00> : vector<16x128xf32>
    %146 = tpu.matmul %124, %145, %cst_66 {dimension_numbers = #tpu.dot_dimension_numbers<[1], [0], [0], [1], [0, 0, 1, 1], [], []>} : vector<16x256xbf16>, vector<256x128xbf16>, vector<16x128xf32> -> vector<16x128xf32>
    %c1_67 = arith.constant 1 : index
    %c0_68 = arith.constant 0 : index
    %c0_69 = arith.constant 0 : index
    %147 = vector.load %arg7[%c1_67, %c0_68, %c0_69] : memref<2x128x128xbf16, #tpu.memory_space<vmem>>, vector<1x128x128xbf16>
    %148 = vector.shape_cast %147 : vector<1x128x128xbf16> to vector<128x128xbf16>
    %cst_70 = arith.constant dense<0.000000e+00> : vector<16x128xf32>
    %149 = tpu.matmul %143, %148, %cst_70 {dimension_numbers = #tpu.dot_dimension_numbers<[1], [0], [0], [1], [0, 0, 1, 1], [], []>} : vector<16x128xbf16>, vector<128x128xbf16>, vector<16x128xf32> -> vector<16x128xf32>
    %150 = arith.addf %146, %149 : vector<16x128xf32>
    %c0_71 = arith.constant 0 : index
    %c2432 = arith.constant 2432 : index
    %151 = vector.load %arg8[%c0_71, %c2432] : memref<1x2560xf32, #tpu.memory_space<vmem>>, vector<1x128xf32>
    %152 = vector.broadcast %151 : vector<1x128xf32> to vector<16x128xf32>
    %153 = arith.addf %150, %152 : vector<16x128xf32>
    %154 = arith.truncf %153 : vector<16x128xf32> to vector<16x128xbf16>
    %c0_72 = arith.constant 0 : index
    %c0_73 = arith.constant 0 : index
    %155 = vector.load %arg9[%c0_72, %c0_73] : memref<16x128xbf16, #tpu.memory_space<vmem>>, vector<16x128xbf16>
    tpu.vector_store %arg9[%c0_72, %c0_73], %154 {strides = array<i32>} : memref<16x128xbf16, #tpu.memory_space<vmem>>, vector<16x128xbf16>,
    return
  }
  func.func @transform_0(%arg0: i32) -> (i32, i32) {
    %c0_i32 = arith.constant 0 : i32
    %c0_i32_0 = arith.constant 0 : i32
    return %arg0, %c0_i32 : i32, i32
  }
  func.func @transform_1(%arg0: i32) -> (i32, i32) {
    %c0_i32 = arith.constant 0 : i32
    %c0_i32_0 = arith.constant 0 : i32
    %c0_i32_1 = arith.constant 0 : i32
    return %c0_i32, %c0_i32_0 : i32, i32
  }
  func.func @transform_2(%arg0: i32) -> (i32, i32, i32) {
    %c0_i32 = arith.constant 0 : i32
    %c0_i32_0 = arith.constant 0 : i32
    %c0_i32_1 = arith.constant 0 : i32
    %c0_i32_2 = arith.constant 0 : i32
    return %c0_i32, %c0_i32_0, %c0_i32_1 : i32, i32, i32
  }
  func.func @transform_3(%arg0: i32) -> (i32, i32, i32) {
    %c0_i32 = arith.constant 0 : i32
    %c0_i32_0 = arith.constant 0 : i32
    %c0_i32_1 = arith.constant 0 : i32
    %c0_i32_2 = arith.constant 0 : i32
    return %c0_i32, %c0_i32_0, %c0_i32_1 : i32, i32, i32
  }
  func.func @transform_4(%arg0: i32) -> (i32, i32) {
    %c0_i32 = arith.constant 0 : i32
    %c0_i32_0 = arith.constant 0 : i32
    %c0_i32_1 = arith.constant 0 : i32
    return %c0_i32, %c0_i32_0 : i32, i32
  }
  func.func @transform_5(%arg0: i32) -> (i32, i32, i32) {
    %c0_i32 = arith.constant 0 : i32
    %c0_i32_0 = arith.constant 0 : i32
    %c0_i32_1 = arith.constant 0 : i32
    %c0_i32_2 = arith.constant 0 : i32
    return %c0_i32, %c0_i32_0, %c0_i32_1 : i32, i32, i32
  }
  func.func @transform_6(%arg0: i32) -> (i32, i32, i32) {
    %c0_i32 = arith.constant 0 : i32
    %c0_i32_0 = arith.constant 0 : i32
    %c0_i32_1 = arith.constant 0 : i32
    %c0_i32_2 = arith.constant 0 : i32
    return %c0_i32, %c0_i32_0, %c0_i32_1 : i32, i32, i32
  }
  func.func @transform_7(%arg0: i32) -> (i32, i32) {
    %c0_i32 = arith.constant 0 : i32
    %c0_i32_0 = arith.constant 0 : i32
    %c0_i32_1 = arith.constant 0 : i32
    return %c0_i32, %c0_i32_0 : i32, i32
  }
  func.func @transform_8(%arg0: i32) -> (i32, i32) {
    %c0_i32 = arith.constant 0 : i32
    %c0_i32_0 = arith.constant 0 : i32
    return %arg0, %c0_i32 : i32, i32
  }
}

</mosaic_0001>

<bundles_post_ra>
// kernel: custom-call
= control target key start
LH: loop header
LB: loop body
LE: loop exit
PB: predicated region body
PF: predicated region fallthrough
CT: control target
= control target key end

     0   :  { %s6_s0 = inlined_call_operand.vmem [shape: f32[2560], index: 0, kind: output, shape index: {}]  }

// kernel: nerf_forward.1
= control target key start
LH: loop header
LB: loop body
LE: loop exit
PB: predicated region body
PF: predicated region fallthrough
CT: control target
= control target key end

     0   :  { %v4503_v0 = vmov 1   ;;  %v4504_v1 = vmov 0   ;;  %v4505_v4 = vmov 2   ;;  %v4506_v5 = vmov 3   ;;  %s5809_s0 = inlined_call_operand.vmem [shape: f32[16,8], index: 0, kind: input, shape index: {}]   ;;  %s5810_s2 = inlined_call_operand.vmem [shape: bf16[2,128,256], index: 2, kind: input, shape index: {}]   ;;  %s5811_s1 = inlined_call_operand.vmem [shape: f32[16,128], index: 1, kind: input, shape index: {}]   ;;  %s5812_s3 = inlined_call_operand.vmem [shape: bf16[7,256,256], index: 3, kind: input, shape index: {}]   ;;  %s5813_s7 = inlined_call_operand.vmem [shape: f32[1,2560], index: 7, kind: input, shape index: {}]   ;;  %s5814_s6 = inlined_call_operand.vmem [shape: bf16[2,128,128], index: 6, kind: input, shape index: {}]   ;;  %s5815_s4 = inlined_call_operand.vmem [shape: bf16[256,256], index: 4, kind: input, shape index: {}]   ;;  %s5816_s5 = inlined_call_operand.vmem [shape: bf16[2,256,128], index: 5, kind: input, shape index: {}]   ;;  %s5817_s8 = inlined_call_operand.vmem [shape: bf16[16,128], index: 8, kind: output, shape index: {}]  }
   0x1   :  { %4007 = vset.pattern.permute.xlu1 %v4503_v0  ;;  %4006 = vset.pattern.permute.xlu0 %v4504_v1  ;;  %v30_v2 = vld [vmem:[%s5809_s0] sm:$0xff]  ;;  %v31_v3 = vld [vmem:[%s5809_s0 + $0x8] sm:$0xff]  ;;  %v4507_v6 = vmov 4   ;;  %v4508_v7 = vmov 5   ;;  %v4015_v8 = vld [vmem:[%s5810_s2 + $0x74] ss:$8 sps:$4 sm:$0xff]   ;;  %v44_v23 = vlaneseq }
   0x2   :  { %51 = vperm.xlu1 %4007, %v30_v2   ;;  %36 = vperm.xlu0 %4006, %v30_v2   ;;  %v4017_v9 = vld [vmem:[%s5810_s2 + $0x70] ss:$8 sps:$4 sm:$0xff]   ;;  %v4018_v10 = vld [vmem:[%s5810_s2 + $0x64] ss:$8 sps:$4 sm:$0xff]   ;;  %v4020_v11 = vld [vmem:[%s5810_s2 + $0x60] ss:$8 sps:$4 sm:$0xff]  }
   0x3   :  { %499 = vmatprep.mubr.bf16.mxu0 %v4504_v1  ;;  %467 = vmatprep.subr.bf16.mxu0 %v4015_v8  ;;  %v4021_v12 = vld [vmem:[%s5810_s2 + $0x54] ss:$8 sps:$4 sm:$0xff]   ;;  %v4023_v13 = vld [vmem:[%s5810_s2 + $0x50] ss:$8 sps:$4 sm:$0xff]   ;;  %v4024_v14 = vld [vmem:[%s5810_s2 + $0x44] ss:$8 sps:$4 sm:$0xff]  }
   0x4   :  { %468 = vmatpush1.bf16.msra.mxu0 %v4017_v9  ;;  %v4026_v15 = vld [vmem:[%s5810_s2 + $0x40] ss:$8 sps:$4 sm:$0xff]   ;;  %v4027_v16 = vld [vmem:[%s5810_s2 + $0x34] ss:$8 sps:$4 sm:$0xff]   ;;  %v4029_v17 = vld [vmem:[%s5810_s2 + $0x30] ss:$8 sps:$4 sm:$0xff]  }
   0x5   :  { %469 = vmatprep.subr.bf16.mxu0 %v4018_v10  ;;  %v4030_v18 = vld [vmem:[%s5810_s2 + $0x24] ss:$8 sps:$4 sm:$0xff]   ;;  %v4032_v19 = vld [vmem:[%s5810_s2 + $0x20] ss:$8 sps:$4 sm:$0xff]   ;;  %v4033_v20 = vld [vmem:[%s5810_s2 + $0x14] ss:$8 sps:$4 sm:$0xff]  }
   0x6   :  { %55 = vperm.xlu1 %4007, %v31_v3   ;;  %41 = vperm.xlu0 %4006, %v31_v3   ;;  %v4035_v21 = vld [vmem:[%s5810_s2 + $0x10] ss:$8 sps:$4 sm:$0xff]   ;;  %v4036_v22 = vld [vmem:[%s5810_s2 + $0x4] ss:$8 sps:$4 sm:$0xff]   ;;  %v4038_v24 = vld [vmem:[%s5810_s2] ss:$8 sps:$4 sm:$0xff]  }
   0x7   :  { %v4618_v25 = vshrl.u32 %v44_v23, 7  ;;  %v4629_v32 = vld [vmem:[%s5811_s1] sm:$0xff]  ;;  %v4039_v34 = vld [vmem:[%s5812_s3 + $0x74] ss:$8 sps:$4 sm:$0xff]   ;;  %v4041_v36 = vld [vmem:[%s5812_s3 + $0x70] ss:$8 sps:$4 sm:$0xff]  }
   0x8   :  { %470 = vmatpush1.bf16.msra.mxu0 %v4020_v11  ;;  %720 = vmatprep.subr.bf16.mxu1 %v4039_v34  ;;  %v4042_v39 = vld [vmem:[%s5812_s3 + $0x64] ss:$8 sps:$4 sm:$0xff]   ;;  %v4044_v42 = vld [vmem:[%s5812_s3 + $0x60] ss:$8 sps:$4 sm:$0xff]   ;;  %v4045_v44 = vld [vmem:[%s5812_s3 + $0x54] ss:$8 sps:$4 sm:$0xff]  }
   0x9   :  { %471 = vmatprep.subr.bf16.mxu0 %v4021_v12  ;;  %v4621_v28 = vsub.s32 1, %v4618_v25  ;;  %v4624_v29 = vsub.s32 0, %v4618_v25  ;;  %v76_v33 = vsub.s32 2, %v4618_v25  ;;  %v92_v35 = vsub.s32 3, %v4618_v25  ;;  %721 = vmatpush1.bf16.msra.mxu1 %v4041_v36  ;;  %v4047_v50 = vld [vmem:[%s5812_s3 + $0x50] ss:$8 sps:$4 sm:$0xff]  }
   0xa   :  { %4009 = vset.pattern.permute.xlu1 %v4505_v4  ;;  %4008 = vset.pattern.permute.xlu0 %v4505_v4  ;;  %v108_v48 = vsub.s32 4, %v4618_v25  ;;  %v124_v49 = vsub.s32 5, %v4618_v25  ;;  %v4048_v53 = vld [vmem:[%s5812_s3 + $0x44] ss:$8 sps:$4 sm:$0xff]   ;;  %v4050_v59 = vld [vmem:[%s5812_s3 + $0x40] ss:$8 sps:$4 sm:$0xff]  }
   0xb   :  { %71 = vperm.xlu1 %4009, %v31_v3   ;;  %67 = vperm.xlu0 %4008, %v30_v2   ;;  %v61_v37 = vrot.slane %v4629_v32, %v4621_v28  ;;  %v47_v38 = vrot.slane %v4629_v32, %v4624_v29  ;;  %v77_v43 = vrot.slane %v4629_v32, %v76_v33  ;;  %v4051_v61 = vld [vmem:[%s5812_s3 + $0x34] ss:$8 sps:$4 sm:$0xff]   ;;  %v4053_v8 = vld [vmem:[%s5812_s3 + $0x30] ss:$8 sps:$4 sm:$0xff]   ;;  %v4054_v11 = vld [vmem:[%s5812_s3 + $0x24] ss:$8 sps:$4 sm:$0xff]  }
   0xc   :  { %472 = vmatpush1.bf16.msra.mxu0 %v4023_v13  ;;  %722 = vmatprep.subr.bf16.mxu1 %v4042_v39  ;;  %v93_v45 = vrot.slane %v4629_v32, %v92_v35  ;;  %v109_v57 = vrot.slane %v4629_v32, %v108_v48  ;;  %v125_v58 = vrot.slane %v4629_v32, %v124_v49  ;;  %v4060_v33 = vld [vmem:[%s5812_s3 + $0x4] ss:$8 sps:$4 sm:$0xff]   ;;  %v4062_v36 = vld [vmem:[%s5812_s3] ss:$8 sps:$4 sm:$0xff]  }
   0xd   :  { %473 = vmatprep.subr.bf16.mxu0 %v4024_v14  ;;  %723 = vmatpush1.bf16.msra.mxu1 %v4044_v42  ;;  %v4066_v48 = vld [vmem:[%s5812_s3 + $0xe4] ss:$8 sps:$4 sm:$0xff]  }
   0xe   :  { %724 = vmatprep.subr.bf16.mxu1 %v4045_v44  ;;  %v4065_v44 = vld [vmem:[%s5812_s3 + $0xf0] ss:$8 sps:$4 sm:$0xff]  }
   0xf   :  { %4010 = vset.pattern.permute.xlu1 %v4506_v5  ;;  %4011 = vset.pattern.permute.xlu0 %v4506_v5 }
  0x10   :  { %83 = vperm.xlu1 %4010, %v30_v2   ;;  %87 = vperm.xlu0 %4011, %v31_v3  }
  0x11   :  { %474 = vmatpush1.bf16.msra.mxu0 %v4026_v15  ;;  %725 = vmatpush1.bf16.msra.mxu1 %v4047_v50  ;;  %v4056_v15 = vld [vmem:[%s5812_s3 + $0x20] ss:$8 sps:$4 sm:$0xff]  }
  0x12   :  { %475 = vmatprep.subr.bf16.mxu0 %v4027_v16  ;;  %726 = vmatprep.subr.bf16.mxu1 %v4048_v53 }
  0x14   :  { %4012 = vset.pattern.permute.xlu1 %v4507_v6  ;;  %4013 = vset.pattern.permute.xlu0 %v4508_v7 }
  0x15   :  { %99 = vperm.xlu1 %4012, %v30_v2   ;;  %115 = vperm.xlu0 %4013, %v30_v2   ;;  %v33_v2 = vld [vmem:[%s5811_s1 + $0x8] sm:$0xff] }
  0x16   :  { %476 = vmatpush1.bf16.msra.mxu0 %v4029_v17  ;;  %727 = vmatpush1.bf16.msra.mxu1 %v4050_v59  ;;  %v139_v10 = vrot.slane %v33_v2, %v4624_v29  ;;  %v4057_v17 = vld [vmem:[%s5812_s3 + $0x14] ss:$8 sps:$4 sm:$0xff]   ;;  %v4510_v59 = vmov 2475754826  }
  0x17   :  { %477 = vmatprep.subr.bf16.mxu0 %v4030_v18  ;;  %728 = vmatprep.subr.bf16.mxu1 %v4051_v61  ;;  %v4511_v61 = vmov 2131351028  }
  0x19   :  { %103 = vperm.xlu1 %4012, %v31_v3  }
  0x1a   :  { %478 = vmatpush1.bf16.msra.mxu0 %v4032_v19  ;;  %729 = vmatpush1.bf16.msra.mxu1 %v4053_v8 }
  0x1b   :  { %479 = vmatprep.subr.bf16.mxu0 %v4033_v20  ;;  %730 = vmatprep.subr.bf16.mxu1 %v4054_v11  ;;  %v4071_v11 = vld [vmem:[%s5812_s3 + $0xd0] ss:$8 sps:$4 sm:$0xff]  }
  0x1d   :  { %4014 = vset.pattern.permute.xlu1 %v4508_v7 }
  0x1e   :  { %119 = vperm.xlu1 %4014, %v31_v3   ;;  %480 = vmatpush1.bf16.msra.mxu0 %v4035_v21 }
  0x1f   :  { %481 = vmatprep.subr.bf16.mxu0 %v4036_v22  ;;  %v4059_v22 = vld [vmem:[%s5812_s3 + $0x10] ss:$8 sps:$4 sm:$0xff]   ;;  %731 = vmatpush1.bf16.msra.mxu1 %v4056_v15 }
  0x20   :  { %732 = vmatprep.subr.bf16.mxu1 %v4057_v17  ;;  %v4072_v17 = vld [vmem:[%s5812_s3 + $0xc4] ss:$8 sps:$4 sm:$0xff]  }
  0x22   :  { %482 = vmatpush1.bf16.msra.mxu0 %v4038_v24 }
  0x23   :  { %733 = vmatpush1.bf16.msra.mxu1 %v4059_v22 }
  0x24   :  { %734 = vmatprep.subr.bf16.mxu1 %v4060_v33  ;;  %v4074_v33 = vld [vmem:[%s5812_s3 + $0xc0] ss:$8 sps:$4 sm:$0xff]  }
  0x27   :  { %735 = vmatpush1.bf16.msra.mxu1 %v4062_v36 }
  0x7d   :  { %v52_v26 = vpop.permute.xlu1 %51  ;;  %v37_v27 = vpop.permute.xlu0 %36 }
  0x7e   :  { %v62_v46 = vmul.f32 %v61_v37, %v52_v26  ;;  %v48_v47 = vmul.f32 %v47_v38, %v37_v27 }
  0x80   :  { %v64_v55 = vadd.f32 %v62_v46, %v48_v47 }
  0x81   :  { %v56_v30 = vpop.permute.xlu1 %55  ;;  %v42_v31 = vpop.permute.xlu0 %41 }
  0x82   :  { %v63_v62 = vmul.f32 %v61_v37, %v56_v30  ;;  %v49_v63 = vmul.f32 %v47_v38, %v42_v31  ;;  %v4063_v38 = vld [vmem:[%s5812_s3 + $0xf4] ss:$8 sps:$4 sm:$0xff]  }
  0x83   :  { %736 = vmatprep.subr.bf16.mxu1 %v4063_v38  ;;  %v4075_v38 = vld [vmem:[%s5812_s3 + $0xb4] ss:$8 sps:$4 sm:$0xff]  }
  0x84   :  { %v65_v12 = vadd.f32 %v63_v62, %v49_v63  ;;  %v4512_v63 = vmov 2102212464   ;;  %737 = vmatpush2.bf16.msra.mxu1 %v4065_v44 }
  0x85   :  { %738 = vmatprep.subr.bf16.mxu1 %v4066_v48 }
  0x86   :  { %v72_v40 = vpop.permute.xlu1 %71  ;;  %v68_v41 = vpop.permute.xlu0 %67 }
  0x87   :  { %v78_v51 = vmul.f32 %v77_v43, %v68_v41  ;;  %v79_v7 = vmul.f32 %v77_v43, %v72_v40 }
  0x89   :  { %v80_v60 = vadd.f32 %v78_v51, %v64_v55  ;;  %v81_v18 = vadd.f32 %v79_v7, %v65_v12 }
  0x8b   :  { %v84_v52 = vpop.permute.xlu1 %83  ;;  %v88_v54 = vpop.permute.xlu0 %87 }
  0x8c   :  { %v94_v56 = vmul.f32 %v93_v45, %v84_v52  ;;  %v95_v13 = vmul.f32 %v93_v45, %v88_v54  ;;  %v4068_v52 = vld [vmem:[%s5812_s3 + $0xe0] ss:$8 sps:$4 sm:$0xff]  }
  0x8d   :  { %739 = vmatpush2.bf16.msra.mxu1 %v4068_v52 }
  0x8e   :  { %v96_v4 = vadd.f32 %v94_v56, %v80_v60  ;;  %v97_v21 = vadd.f32 %v95_v13, %v81_v18  ;;  %v4069_v56 = vld [vmem:[%s5812_s3 + $0xd4] ss:$8 sps:$4 sm:$0xff]  }
  0x8f   :  { %740 = vmatprep.subr.bf16.mxu1 %v4069_v56 }
  0x90   :  { %v100_v0 = vpop.permute.xlu1 %99  ;;  %v116_v3 = vpop.permute.xlu0 %115 }
  0x91   :  { %v110_v5 = vmul.f32 %v109_v57, %v100_v0  ;;  %v126_v6 = vmul.f32 %v125_v58, %v116_v3  ;;  %741 = vmatpush2.bf16.msra.mxu1 %v4071_v11 }
  0x92   :  { %742 = vmatprep.subr.bf16.mxu1 %v4072_v17 }
  0x93   :  { %v112_v9 = vadd.f32 %v110_v5, %v96_v4  ;;  %v4513_v5 = vmov 920167782  }
  0x94   :  { %v104_v14 = vpop.permute.xlu1 %103 }
  0x95   :  { %v4683_v16 = vadd.f32 %v126_v6, %v112_v9  ;;  %v111_v19 = vmul.f32 %v109_v57, %v104_v14  ;;  %v4509_v57 = vmov 683565275   ;;  %v4514_v9 = vmov 1326507024   ;;  %743 = vmatpush2.bf16.msra.mxu1 %v4074_v33 }
  0x96   :  { %744 = vmatprep.subr.bf16.mxu1 %v4075_v38 }
  0x97   :  { %v4689_v20 = vadd.f32 %v139_v10, %v4683_v16  ;;  %v113_v27 = vadd.f32 %v111_v19, %v97_v21 }
  0x99   :  { %v142_v23 = vand.u32 2147483647, %v4689_v20  ;;  %v145_v24 = vand.u32 2139095040, %v4689_v20  ;;  %v120_v26 = vpop.permute.xlu1 %119  ;;  %vm144_vm15 = vcmp.lt.s32.totalorder %v4689_v20, 0 }
  0x9a   :  { %v127_v30 = vmul.f32 %v125_v58, %v120_v26 }
  0x9b   :  { %v146_v31 = vshrl.u32 %v145_v24, 23  ;;  %v149_v34 = vand.u32 8388607, %v142_v23  ;;  %vm4804_vm13 = vcmp.le.f32.partialorder %v142_v23, 0.7853982 }
  0x9c   :  { %v4701_v35 = vadd.f32 %v127_v30, %v113_v27 }
  0x9d   :  { %v3271_v37 = vadd.s32 4294967169, %v146_v31  ;;  %v150_v41 = vor.u32 8388608, %v149_v34 }
  0x9e   :  { %v4710_v39 = vadd.f32 %v139_v10, %v4701_v35 }
  0x9f   :  { %v152_v40 = vadd.s32 1, %v3271_v37  ;;  %v4724_v51 = vshll.u32 %v150_v41, 8 }
  0xa0   :  { %v246_v42 = vand.u32 2147483647, %v4710_v39  ;;  %v249_v43 = vand.u32 2139095040, %v4710_v39 }
  0xa1   :  { %vm153_vm0 = vcmp.gt.s32.totalorder %v152_v40, 0 }
  0xa2   :  { %v154_v45 = vsel %vm153_vm0, %v152_v40, 0  ;;  %v250_v46 = vshrl.u32 %v249_v43, 23  ;;  %v4719_v47 = vand.u32 8388607, %v246_v42  ;;  %vm248_vm0 = vcmp.lt.s32.totalorder %v4710_v39, 0 }
  0xa3   :  { %v156_v49 = vand.u32 31, %v154_v45  ;;  %v155_v50 = vshrl.u32 %v154_v45, 5 }
  0xa4   :  { %v3275_v54 = vadd.s32 4294967169, %v250_v46  ;;  %v254_v55 = vor.u32 8388608, %v4719_v47 }
  0xa5   :  { %v157_v53 = vsub.s32 32, %v156_v49  ;;  %v159_v58 = vshll.u32 %v4509_v57, %v156_v49  ;;  %v162_v60 = vshll.u32 %v4510_v59, %v156_v49  ;;  %v165_v62 = vshll.u32 %v4511_v61, %v156_v49 }
  0xa6   :  { %v168_v0 = vshll.u32 %v4512_v63, %v156_v49  ;;  %v171_v6 = vshll.u32 %v4513_v5, %v156_v49  ;;  %vm174_vm1 = vcmp.lt.s32.totalorder %v155_v50, 1  ;;  %v256_v15 = vadd.s32 1, %v3275_v54 }
  0xa7   :  { %v160_v2 = vshrl.u32 %v4510_v59, %v157_v53  ;;  %v163_v3 = vshrl.u32 %v4511_v61, %v157_v53  ;;  %v166_v4 = vshrl.u32 %v4512_v63, %v157_v53  ;;  %v158_v7 = vshrl.u32 %v4509_v57, %v157_v53 }
  0xa8   :  { %v169_v8 = vshrl.u32 %v4513_v5, %v157_v53  ;;  %v172_v10 = vshrl.u32 %v4514_v9, %v157_v53  ;;  %vm176_vm2 = vcmp.lt.s32.totalorder %v155_v50, 3  ;;  %vm177_vm3 = vcmp.lt.s32.totalorder %v155_v50, 4 }
  0xa9   :  { %v161_v12 = vor.u32 %v160_v2, %v159_v58  ;;  %v164_v13 = vor.u32 %v163_v3, %v162_v60  ;;  %v167_v14 = vor.u32 %v166_v4, %v165_v62  ;;  %vm257_vm4 = vcmp.gt.s32.totalorder %v256_v15, 0 }
  0xaa   :  { %v170_v18 = vor.u32 %v169_v8, %v168_v0  ;;  %v173_v19 = vor.u32 %v172_v10, %v171_v6  ;;  %vm175_vm5 = vcmp.lt.s32.totalorder %v155_v50, 2  ;;  %v258_v37 = vsel %vm257_vm4, %v256_v15, 0  ;;  %v4077_v50 = vld [vmem:[%s5812_s3 + $0xb0] ss:$8 sps:$4 sm:$0xff]  }
  0xab   :  { %v178_v21 = vsel %vm174_vm1, %v158_v7, %v161_v12  ;;  %v179_v22 = vsel %vm177_vm3, %v167_v14, 2102212464  ;;  %v182_v24 = vsel %vm174_vm1, %v161_v12, %v164_v13  ;;  %v186_v26 = vsel %vm174_vm1, %v164_v13, %v167_v14  ;;  %745 = vmatpush2.bf16.msra.mxu1 %v4077_v50 }
  0xac   :  { %v180_v27 = vsel %vm176_vm2, %v164_v13, %v179_v22  ;;  %v183_v30 = vsel %vm177_vm3, %v170_v18, 920167782  ;;  %v187_v31 = vsel %vm177_vm3, %v173_v19, 1326507024  ;;  %v259_v44 = vshrl.u32 %v258_v37, 5 }
  0xad   :  { %v184_v34 = vsel %vm176_vm2, %v167_v14, %v183_v30  ;;  %v188_v36 = vsel %vm176_vm2, %v170_v18, %v187_v31  ;;  %v181_v40 = vsel %vm175_vm5, %v178_v21, %v180_v27  ;;  %v260_v49 = vand.u32 31, %v258_v37 }
  0xae   :  { %v185_v41 = vsel %vm175_vm5, %v182_v24, %v184_v34  ;;  %v189_v43 = vsel %vm175_vm5, %v186_v26, %v188_v36  ;;  %v294_v52 = vshll.u32 %v254_v55, 8  ;;  %v197_v53 = vmul.u32 %v4724_v51, %v181_v40 }
  0xaf   :  { %v4756_v45 = vmul.u32.u64.low %v4724_v51, %v189_v43  ;;  %v4757_v46 = vmul.u32.u64.high %v4724_v51, %v189_v43, %v4756_v45  ;;  %v4760_v47 = vmul.u32.u64.low %v4724_v51, %v185_v41  ;;  %v4761_v48 = vmul.u32.u64.high %v4724_v51, %v185_v41, %v4760_v47 }
  0xb0   :  { %v261_v54 = vsub.s32 32, %v260_v49  ;;  %v263_v56 = vshll.u32 %v4509_v57, %v260_v49  ;;  %vm278_vm6 = vcmp.lt.s32.totalorder %v259_v44, 1  ;;  %v266_v60 = vshll.u32 %v4510_v59, %v260_v49 }
  0xb1   :  { %vm199_vm7 = vc.u32 %v4757_v46, %v4760_v47  ;;  %v200_v58 = vadd.s32 1, %v4761_v48  ;;  %v269_v62 = vshll.u32 %v4511_v61, %v260_v49  ;;  %v272_v2 = vshll.u32 %v4512_v63, %v260_v49 }
  0xb2   :  { %v264_v0 = vshrl.u32 %v4510_v59, %v261_v54  ;;  %v267_v55 = vshrl.u32 %v4511_v61, %v261_v54  ;;  %v270_v51 = vshrl.u32 %v4512_v63, %v261_v54  ;;  %v273_v4 = vshrl.u32 %v4513_v5, %v261_v54 }
  0xb3   :  { %v201_v3 = vsel %vm199_vm7, %v200_v58, %v4761_v48  ;;  %v275_v6 = vshll.u32 %v4513_v5, %v260_v49  ;;  %v276_v7 = vshrl.u32 %v4514_v9, %v261_v54  ;;  %vm280_vm8 = vcmp.lt.s32.totalorder %v259_v44, 3 }
  0xb4   :  { %v202_v8 = vadd.s32 %v201_v3, %v197_v53  ;;  %v265_v10 = vor.u32 %v264_v0, %v263_v56  ;;  %v268_v11 = vor.u32 %v267_v55, %v266_v60  ;;  %v271_v12 = vor.u32 %v270_v51, %v269_v62 }
  0xb5   :  { %v274_v13 = vor.u32 %v273_v4, %v272_v2  ;;  %v277_v59 = vor.u32 %v276_v7, %v275_v6  ;;  %vm281_vm9 = vcmp.lt.s32.totalorder %v259_v44, 4  ;;  %v262_v15 = vshrl.u32 %v4509_v57, %v261_v54 }
  0xb6   :  { %v203_v61 = vadd.s32 536870912, %v202_v8  ;;  %v283_v14 = vsel %vm281_vm9, %v271_v12, 2102212464  ;;  %v286_v63 = vsel %vm278_vm6, %v265_v10, %v268_v11  ;;  %v290_v18 = vsel %vm278_vm6, %v268_v11, %v271_v12 }
  0xb7   :  { %v287_v17 = vsel %vm281_vm9, %v274_v13, 920167782  ;;  %v291_v5 = vsel %vm281_vm9, %v277_v59, 1326507024  ;;  %vm279_vm10 = vcmp.lt.s32.totalorder %v259_v44, 2  ;;  %v282_v22 = vsel %vm278_vm6, %v262_v15, %v265_v10 }
  0xb8   :  { %v4784_v9 = vshrl.u32 %v203_v61, 30  ;;  %v288_v19 = vsel %vm280_vm8, %v271_v12, %v287_v17  ;;  %v292_v21 = vsel %vm280_vm8, %v274_v13, %v291_v5  ;;  %v284_v30 = vsel %vm280_vm8, %v268_v11, %v283_v14 }
  0xb9   :  { %v289_v24 = vsel %vm279_vm10, %v286_v63, %v288_v19  ;;  %v293_v26 = vsel %vm279_vm10, %v290_v18, %v292_v21  ;;  %v285_v37 = vsel %vm279_vm10, %v282_v22, %v284_v30  ;;  %v198_v56 = vadd.s32 %v4760_v47, %v4757_v46  ;;  %v4080_v46 = vld [vmem:[%s5812_s3 + $0xa0] ss:$8 sps:$4 sm:$0xff]  }
  0xba   :  { %v205_v27 = vshll.u32 %v4784_v9, 30  ;;  %v4791_v57 = vmul.u32.u64.low %v294_v52, %v293_v26  ;;  %v4792_v31 = vmul.u32.u64.high %v294_v52, %v293_v26, %v4791_v57  ;;  %v301_v43 = vmul.u32 %v294_v52, %v285_v37 }
  0xbb   :  { %v4794_v33 = vmul.u32.u64.low %v294_v52, %v289_v24  ;;  %v4795_v34 = vmul.u32.u64.high %v294_v52, %v289_v24, %v4794_v33  ;;  %v228_v61 = vsub.s32 4, %v4784_v9  ;;  %vm4821_vm1 = vcmp.le.f32.partialorder %v246_v42, 0.7853982 }
  0xbc   :  { %v206_v36 = vsub.s32 %v202_v8, %v205_v27  ;;  %vm234_vm5 = vweird.f32 %v4689_v20  ;;  %vm338_vm9 = vweird.f32 %v4710_v39  ;;  %vm4516_vm10 = vmmov 0  }
  0xbd   :  { %vm303_vm11 = vc.u32 %v4792_v31, %v4794_v33  ;;  %v304_v40 = vadd.s32 1, %v4795_v34  ;;  %v302_v63 = vadd.s32 %v4794_v33, %v4792_v31  ;;  %v229_v21 = vsel %vm144_vm15, %v228_v61, %v4784_v9  ;;  %v4087_v61 = vld [vmem:[%s5812_s3 + $0x170] ss:$8 sps:$4 sm:$0xff]   ;;  %v4122_v9 = vld [vmem:[%s5812_s3 + $0x1c4] ss:$8 sps:$4 sm:$0xff]  }
  0xbe   :  { %v208_v38 = vsub.s32 0, %v206_v36  ;;  %v231_v27 = vsel %vm4804_vm13, 0, %v229_v21  ;;  %v4099_v21 = vld [vmem:[%s5812_s3 + $0x130] ss:$8 sps:$4 sm:$0xff]  }
  0xbf   :  { %v305_v45 = vsel %vm303_vm11, %v304_v40, %v4795_v34  ;;  %v235_v31 = vadd.s32 3, %v231_v27  ;;  %v4105_v27 = vld [vmem:[%s5812_s3 + $0x110] ss:$8 sps:$4 sm:$0xff]  }
  0xc0   :  { %v3272_v41 = vmin.u32 %v208_v38, %v206_v36  ;;  %v306_v44 = vadd.s32 %v305_v45, %v301_v43  ;;  %v132_v38 = vsub.s32 6, %v4618_v25 }
  0xc2   :  { %v210_v48 = vclz %v3272_v41  ;;  %v307_v50 = vadd.s32 536870912, %v306_v44  ;;  %v352_v41 = vsub.s32 7, %v4618_v25  ;;  %v133_v42 = vrot.slane %v4629_v32, %v132_v38  ;;  %v4117_v38 = vld [vmem:[%s5812_s3 + $0x1d0] ss:$8 sps:$4 sm:$0xff]  }
  0xc4   :  { %v3273_v49 = vadd.s32 4294967294, %v210_v48  ;;  %v308_v53 = vshrl.u32 %v307_v50, 30 }
  0xc6   :  { %vm3274_vm12 = vcmp.lt.s32.totalorder %v3273_v49, 0  ;;  %v309_v62 = vshll.u32 %v308_v53, 30  ;;  %v332_v37 = vsub.s32 4, %v308_v53 }
  0xc7   :  { %v213_v54 = vsel %vm3274_vm12, 0, %v3273_v49 }
  0xc8   :  { %v214_v58 = vsub.s32 32, %v213_v54  ;;  %v218_v60 = vsub.s32 4294967266, %v213_v54  ;;  %v215_v0 = vshll.u32 %v206_v36, %v213_v54  ;;  %v310_v2 = vsub.s32 %v306_v44, %v309_v62 }
  0xc9   :  { %v236_v36 = vand.u32 3, %v235_v31  ;;  %v333_v50 = vsel %vm248_vm0, %v332_v37, %v308_v53  ;;  %v4113_v31 = vld [vmem:[%s5812_s3 + $0x1f4] ss:$8 sps:$4 sm:$0xff]  }
  0xca   :  { %v216_v55 = vshrl.u32 %v198_v56, %v214_v58  ;;  %v219_v51 = vadd.s32 127, %v218_v60  ;;  %v312_v4 = vsub.s32 0, %v310_v2  ;;  %v353_v56 = vrot.slane %v4629_v32, %v352_v41  ;;  %v4119_v37 = vld [vmem:[%s5812_s3 + $0x1d4] ss:$8 sps:$4 sm:$0xff]  }
  0xcb   :  { %vm241_vm2 = vcmp.eq.s32.totalorder %v236_v36, 2  ;;  %vm238_vm3 = vcmp.eq.s32.totalorder %v236_v36, 0  ;;  %vm237_vm4 = vcmp.lt.s32.totalorder %v236_v36, 2  ;;  %v335_v60 = vsel %vm4821_vm1, 0, %v333_v50  ;;  %v4114_v36 = vld [vmem:[%s5812_s3 + $0x1e0] ss:$8 sps:$4 sm:$0xff]  }
  0xcc   :  { %v217_v52 = vor.u32 %v216_v55, %v215_v0  ;;  %v220_v3 = vshll.u32 %v219_v51, 23  ;;  %v3276_v7 = vmin.u32 %v312_v4, %v310_v2  ;;  %v134_v0 = vmul.f32 %v133_v42, %v4683_v16  ;;  %v4125_v41 = vld [vmem:[%s5812_s3 + $0x1b4] ss:$8 sps:$4 sm:$0xff]  }
  0xcd   :  { %v339_v51 = vadd.s32 3, %v335_v60 }
  0xce   :  { %v221_v6 = vor.u32 4788187, %v220_v3  ;;  %v224_v10 = vcvt.s32.f32 %v217_v52  ;;  %v314_v11 = vclz %v3276_v7 }
  0xd0   :  { %v222_v8 = vand.u32 2147483647, %v221_v6  ;;  %v3277_v13 = vadd.s32 4294967294, %v314_v11 }
  0xd2   :  { %v225_v12 = vmul.f32 %v224_v10, %v222_v8  ;;  %vm3278_vm14 = vcmp.lt.s32.totalorder %v3277_v13, 0  ;;  %v135_v10 = vmul.f32 %v133_v42, %v4701_v35  ;;  %v4081_v35 = vld [vmem:[%s5812_s3 + $0x94] ss:$8 sps:$4 sm:$0xff]  }
  0xd3   :  { %v317_v59 = vsel %vm3278_vm14, 0, %v3277_v13  ;;  %v4078_v13 = vld [vmem:[%s5812_s3 + $0xa4] ss:$8 sps:$4 sm:$0xff]  }
  0xd4   :  { %v226_v47 = vxor.u32 2147483648, %v225_v12  ;;  %v318_v15 = vsub.s32 32, %v317_v59  ;;  %v322_v17 = vsub.s32 4294967266, %v317_v59  ;;  %v319_v23 = vshll.u32 %v310_v2, %v317_v59  ;;  %746 = vmatprep.subr.bf16.mxu1 %v4078_v13  ;;  %v4086_v59 = vld [vmem:[%s5812_s3 + $0x80] ss:$8 sps:$4 sm:$0xff]  }
  0xd5   :  { %v340_v2 = vand.u32 3, %v339_v51  ;;  %747 = vmatpush2.bf16.msra.mxu1 %v4080_v46  ;;  %v4167_v13 = vld [vmem:[%s5812_s3 + $0x254] ss:$8 sps:$4 sm:$0xff]   ;;  %v4165_v46 = vld [vmem:[%s5812_s3 + $0x250] ss:$8 sps:$4 sm:$0xff]  }
  0xd6   :  { %v227_v14 = vsel %vm144_vm15, %v226_v47, %v225_v12  ;;  %v320_v5 = vshrl.u32 %v302_v63, %v318_v15  ;;  %v323_v19 = vadd.s32 127, %v322_v17  ;;  %748 = vmatprep.subr.bf16.mxu1 %v4081_v35  ;;  %v4084_v47 = vld [vmem:[%s5812_s3 + $0x84] ss:$8 sps:$4 sm:$0xff]   ;;  %v4090_v15 = vld [vmem:[%s5812_s3 + $0x160] ss:$8 sps:$4 sm:$0xff]  }
  0xd7   :  { %v230_v18 = vsel %vm4804_vm13, %v4689_v20, %v227_v14  ;;  %vm345_vm6 = vcmp.eq.s32.totalorder %v340_v2, 2  ;;  %vm342_vm7 = vcmp.eq.s32.totalorder %v340_v2, 0  ;;  %vm341_vm8 = vcmp.lt.s32.totalorder %v340_v2, 2  ;;  %v4089_v14 = vld [vmem:[%s5812_s3 + $0x174] ss:$8 sps:$4 sm:$0xff]  }
  0xd8   :  { %4495 = vcosq.f32 %v230_v18  ;;  %v321_v22 = vor.u32 %v320_v5, %v319_v23  ;;  %v324_v24 = vshll.u32 %v323_v19, 23  ;;  %v4092_v63 = vld [vmem:[%s5812_s3 + $0x164] ss:$8 sps:$4 sm:$0xff]   ;;  %974 = vmatprep.subr.bf16.mxu0 %v4089_v14  ;;  %v4095_v17 = vld [vmem:[%s5812_s3 + $0x154] ss:$8 sps:$4 sm:$0xff]  }
  0xd9   :  { %4497 = vsinq.f32 %v230_v18  ;;  %v4093_v18 = vld [vmem:[%s5812_s3 + $0x150] ss:$8 sps:$4 sm:$0xff]   ;;  %v4098_v23 = vld [vmem:[%s5812_s3 + $0x144] ss:$8 sps:$4 sm:$0xff]   ;;  %v4096_v5 = vld [vmem:[%s5812_s3 + $0x140] ss:$8 sps:$4 sm:$0xff]  }
  0xda   :  { %v325_v26 = vor.u32 4788187, %v324_v24  ;;  %v328_v57 = vcvt.s32.f32 %v321_v22  ;;  %v4101_v19 = vld [vmem:[%s5812_s3 + $0x134] ss:$8 sps:$4 sm:$0xff]   ;;  %v4104_v22 = vld [vmem:[%s5812_s3 + $0x124] ss:$8 sps:$4 sm:$0xff]  }
  0xdb   :  { %v4102_v24 = vld [vmem:[%s5812_s3 + $0x120] ss:$8 sps:$4 sm:$0xff]   ;;  %v4170_v35 = vld [vmem:[%s5812_s3 + $0x244] ss:$8 sps:$4 sm:$0xff]  }
  0xdc   :  { %v326_v30 = vand.u32 2147483647, %v325_v26  ;;  %v4107_v26 = vld [vmem:[%s5812_s3 + $0x114] ss:$8 sps:$4 sm:$0xff]   ;;  %v4174_v14 = vld [vmem:[%s5812_s3 + $0x220] ss:$8 sps:$4 sm:$0xff]  }
  0xde   :  { %v329_v33 = vmul.f32 %v328_v57, %v326_v30  ;;  %v4110_v30 = vld [vmem:[%s5812_s3 + $0x104] ss:$8 sps:$4 sm:$0xff]   ;;  %v4108_v57 = vld [vmem:[%s5812_s3 + $0x100] ss:$8 sps:$4 sm:$0xff]  }
  0xe0   :  { %v330_v34 = vxor.u32 2147483648, %v329_v33 }
  0xe2   :  { %v331_v40 = vsel %vm248_vm0, %v330_v34, %v329_v33  ;;  %v4111_v33 = vld [vmem:[%s5812_s3 + $0x1f0] ss:$8 sps:$4 sm:$0xff]   ;;  %v4116_v34 = vld [vmem:[%s5812_s3 + $0x1e4] ss:$8 sps:$4 sm:$0xff]  }
  0xe3   :  { %v334_v45 = vsel %vm4821_vm1, %v4710_v39, %v331_v40  ;;  %v4083_v39 = vld [vmem:[%s5812_s3 + $0x90] ss:$8 sps:$4 sm:$0xff]   ;;  %v4120_v40 = vld [vmem:[%s5812_s3 + $0x1c0] ss:$8 sps:$4 sm:$0xff]  }
  0xe4   :  { %4499 = vcosq.f32 %v334_v45  ;;  %749 = vmatpush2.bf16.msra.mxu1 %v4083_v39  ;;  %v4168_v39 = vld [vmem:[%s5812_s3 + $0x240] ss:$8 sps:$4 sm:$0xff]  }
  0xe5   :  { %v4496_v43 = vpop.eup %4495  ;;  %4501 = vsinq.f32 %v334_v45  ;;  %750 = vmatprep.subr.bf16.mxu1 %v4084_v47  ;;  %v375_v45 = vld [vmem:[%s5813_s7] sm:$0x3]  ;;  %v4173_v47 = vld [vmem:[%s5812_s3 + $0x234] ss:$8 sps:$4 sm:$0xff]  }
  0xe6   :  { %v4498_v48 = vpop.eup %4497  ;;  %v242_v44 = vxor.u32 2147483648, %v4496_v43 }
  0xe7   :  { %v239_v49 = vxor.u32 2147483648, %v4498_v48 }
  0xe8   :  { %v243_v54 = vsel %vm241_vm2, %v242_v44, %v4498_v48  ;;  %751 = vmatpush2.bf16.msra.mxu1 %v4086_v59  ;;  %v384_v44 = vrot.slane %v375_v45, %v4621_v28  ;;  %v4171_v59 = vld [vmem:[%s5812_s3 + $0x230] ss:$8 sps:$4 sm:$0xff]  }
  0xe9   :  { %v240_v25 = vsel %vm238_vm3, %v4496_v43, %v239_v49  ;;  %v4123_v43 = vld [vmem:[%s5812_s3 + $0x1b0] ss:$8 sps:$4 sm:$0xff]   ;;  %v380_v49 = vrot.slane %v375_v45, %v4624_v29 }
  0xea   :  { %v244_v58 = vsel %vm237_vm4, %v240_v25, %v243_v54 }
  0xeb   :  { %v245_v62 = vsel %vm234_vm5, nan, %v244_v58 }
  0xec   :  { %v354_v55 = vmul.f32 %v353_v56, %v245_v62 }
  0xee   :  { %v356_v53 = vadd.f32 %v354_v55, %v134_v0 }
  0xf1   :  { %v4500_v52 = vpop.eup %4499 }
  0xf2   :  { %v4502_v3 = vpop.eup %4501  ;;  %v346_v4 = vxor.u32 2147483648, %v4500_v52 }
  0xf3   :  { %v343_v6 = vxor.u32 2147483648, %v4502_v3 }
  0xf4   :  { %v347_v32 = vsel %vm345_vm6, %v346_v4, %v4502_v3  ;;  %v4126_v3 = vld [vmem:[%s5812_s3 + $0x1a0] ss:$8 sps:$4 sm:$0xff]   ;;  %v4131_v4 = vld [vmem:[%s5812_s3 + $0x194] ss:$8 sps:$4 sm:$0xff]  }
  0xf5   :  { %v344_v20 = vsel %vm342_vm7, %v4500_v52, %v343_v6  ;;  %v4128_v52 = vld [vmem:[%s5812_s3 + $0x1a4] ss:$8 sps:$4 sm:$0xff]   ;;  %v4129_v6 = vld [vmem:[%s5812_s3 + $0x190] ss:$8 sps:$4 sm:$0xff]  }
  0xf6   :  { %v348_v7 = vsel %vm341_vm8, %v344_v20, %v347_v32  ;;  %v4134_v32 = vld [vmem:[%s5812_s3 + $0x184] ss:$8 sps:$4 sm:$0xff]   ;;  %v4132_v20 = vld [vmem:[%s5812_s3 + $0x180] ss:$8 sps:$4 sm:$0xff]  }
  0xf7   :  { %v349_v8 = vsel %vm338_vm9, nan, %v348_v7  ;;  %v4137_v7 = vld [vmem:[%s5810_s2 + $0xf4] ss:$8 sps:$4 sm:$0xff]  }
  0xf8   :  { %v355_v16 = vmul.f32 %v353_v56, %v349_v8  ;;  %v4159_v8 = vld [vmem:[%s5812_s3 + $0x270] ss:$8 sps:$4 sm:$0xff]  }
  0xfa   :  { %v357_v11 = vadd.f32 %v355_v16, %v135_v10  ;;  %v4161_v10 = vld [vmem:[%s5812_s3 + $0x274] ss:$8 sps:$4 sm:$0xff]   ;;  %v4164_v16 = vld [vmem:[%s5812_s3 + $0x264] ss:$8 sps:$4 sm:$0xff]  }
  0xfb   :  { %1228 = vmatprep.subr.bf16.mxu1 %v4161_v10  ;;  %v4206_v10 = vld [vmem:[%s5812_s3 + $0x284] ss:$8 sps:$4 sm:$0xff]  }
  0xfc   :  { %v4837_v12 = vpack.c.bf16 %v357_v11, %v356_v53  ;;  %v4162_v11 = vld [vmem:[%s5812_s3 + $0x260] ss:$8 sps:$4 sm:$0xff]  }
  0xfe   :  { %500 = vmatmul.mubr.bf16.vlgmr.msra.gmra.mxu0 %v4837_v12 }
  0xff   :  { %975 = vmatpush1.bf16.msra.mxu0 %v4087_v61  ;;  %v4176_v61 = vld [vmem:[%s5812_s3 + $0x224] ss:$8 sps:$4 sm:$0xff]  }
 0x100   :  { %976 = vmatprep.subr.bf16.mxu0 %v4092_v63  ;;  %v4179_v63 = vld [vmem:[%s5812_s3 + $0x214] ss:$8 sps:$4 sm:$0xff]  }
 0x103   :  { %977 = vmatpush1.bf16.msra.mxu0 %v4090_v15  ;;  %v4177_v15 = vld [vmem:[%s5812_s3 + $0x210] ss:$8 sps:$4 sm:$0xff]  }
 0x104   :  { %978 = vmatprep.subr.bf16.mxu0 %v4095_v17  ;;  %v4182_v17 = vld [vmem:[%s5812_s3 + $0x204] ss:$8 sps:$4 sm:$0xff]  }
 0x107   :  { %979 = vmatpush1.bf16.msra.mxu0 %v4093_v18  ;;  %v4180_v18 = vld [vmem:[%s5812_s3 + $0x200] ss:$8 sps:$4 sm:$0xff]  }
 0x108   :  { %980 = vmatprep.subr.bf16.mxu0 %v4098_v23  ;;  %v4185_v23 = vld [vmem:[%s5812_s3 + $0x2f4] ss:$8 sps:$4 sm:$0xff]  }
 0x10b   :  { %981 = vmatpush1.bf16.msra.mxu0 %v4096_v5  ;;  %v4183_v5 = vld [vmem:[%s5812_s3 + $0x2f0] ss:$8 sps:$4 sm:$0xff]  }
 0x10c   :  { %982 = vmatprep.subr.bf16.mxu0 %v4101_v19  ;;  %v4188_v19 = vld [vmem:[%s5812_s3 + $0x2e4] ss:$8 sps:$4 sm:$0xff]  }
 0x10f   :  { %983 = vmatpush1.bf16.msra.mxu0 %v4099_v21  ;;  %v4186_v21 = vld [vmem:[%s5812_s3 + $0x2e0] ss:$8 sps:$4 sm:$0xff]  }
 0x110   :  { %984 = vmatprep.subr.bf16.mxu0 %v4104_v22  ;;  %v4191_v22 = vld [vmem:[%s5812_s3 + $0x2d4] ss:$8 sps:$4 sm:$0xff]  }
 0x113   :  { %985 = vmatpush1.bf16.msra.mxu0 %v4102_v24  ;;  %v4189_v24 = vld [vmem:[%s5812_s3 + $0x2d0] ss:$8 sps:$4 sm:$0xff]  }
 0x114   :  { %986 = vmatprep.subr.bf16.mxu0 %v4107_v26  ;;  %v4194_v26 = vld [vmem:[%s5812_s3 + $0x2c4] ss:$8 sps:$4 sm:$0xff]  }
 0x117   :  { %987 = vmatpush1.bf16.msra.mxu0 %v4105_v27  ;;  %v4192_v27 = vld [vmem:[%s5812_s3 + $0x2c0] ss:$8 sps:$4 sm:$0xff]  }
 0x118   :  { %988 = vmatprep.subr.bf16.mxu0 %v4110_v30  ;;  %v4197_v30 = vld [vmem:[%s5812_s3 + $0x2b4] ss:$8 sps:$4 sm:$0xff]  }
 0x11b   :  { %989 = vmatpush1.bf16.msra.mxu0 %v4108_v57  ;;  %v4195_v57 = vld [vmem:[%s5812_s3 + $0x2b0] ss:$8 sps:$4 sm:$0xff]  }
 0x11c   :  { %990 = vmatprep.subr.bf16.mxu0 %v4113_v31  ;;  %v548_v31 = vld [vmem:[%s5813_s7 + $0x2] sm:$0x3] }
 0x11f   :  { %991 = vmatpush2.bf16.msra.mxu0 %v4111_v33 }
 0x120   :  { %992 = vmatprep.subr.bf16.mxu0 %v4116_v34  ;;  %v557_v34 = vrot.slane %v548_v31, %v4621_v28 }
 0x123   :  { %993 = vmatpush2.bf16.msra.mxu0 %v4114_v36  ;;  %v553_v36 = vrot.slane %v548_v31, %v4624_v29  ;;  %v4240_v31 = vld [vmem:[%s5812_s3 + $0x3c0] ss:$8 sps:$4 sm:$0xff]  }
 0x124   :  { %994 = vmatprep.subr.bf16.mxu0 %v4119_v37 }
 0x127   :  { %995 = vmatpush2.bf16.msra.mxu0 %v4117_v38 }
 0x128   :  { %996 = vmatprep.subr.bf16.mxu0 %v4122_v9 }
 0x12b   :  { %997 = vmatpush2.bf16.msra.mxu0 %v4120_v40 }
 0x12c   :  { %998 = vmatprep.subr.bf16.mxu0 %v4125_v41 }
 0x12f   :  { %999 = vmatpush2.bf16.msra.mxu0 %v4123_v43 }
 0x130   :  { %1000 = vmatprep.subr.bf16.mxu0 %v4128_v52  ;;  %v4155_v52 = vld [vmem:[%s5810_s2 + $0x94] ss:$8 sps:$4 sm:$0xff]  }
 0x133   :  { %1001 = vmatpush2.bf16.msra.mxu0 %v4126_v3  ;;  %v4153_v3 = vld [vmem:[%s5810_s2 + $0x90] ss:$8 sps:$4 sm:$0xff]  }
 0x134   :  { %1002 = vmatprep.subr.bf16.mxu0 %v4131_v4  ;;  %v4158_v4 = vld [vmem:[%s5810_s2 + $0x84] ss:$8 sps:$4 sm:$0xff]  }
 0x137   :  { %1003 = vmatpush2.bf16.msra.mxu0 %v4129_v6  ;;  %v4156_v6 = vld [vmem:[%s5810_s2 + $0x80] ss:$8 sps:$4 sm:$0xff]  }
 0x138   :  { %1004 = vmatprep.subr.bf16.mxu0 %v4134_v32  ;;  %v4200_v32 = vld [vmem:[%s5812_s3 + $0x2a4] ss:$8 sps:$4 sm:$0xff]  }
 0x13b   :  { %1005 = vmatpush2.bf16.msra.mxu0 %v4132_v20  ;;  %v4198_v20 = vld [vmem:[%s5812_s3 + $0x2a0] ss:$8 sps:$4 sm:$0xff]  }
 0x13c   :  { %1407 = vmatprep.subr.bf16.mxu0 %v4137_v7  ;;  %v4203_v7 = vld [vmem:[%s5812_s3 + $0x294] ss:$8 sps:$4 sm:$0xff]  }
 0x1be   :  { %v501_v48 = vpop.f32.mrf.mxu0 }
 0x1bf   :  { %v502_v25 = vadd.f32 %v501_v48, %v380_v49 }
 0x1c0   :  { %v503_v50 = vpop.f32.mrf.mxu0 }
 0x1c1   :  { %v504_v54 = vadd.f32 %v503_v50, %v384_v44  ;;  %v510_v51 = vmax.f32 %v502_v25, 0.0  ;;  %v4140_v25 = vld [vmem:[%s5810_s2 + $0xe4] ss:$8 sps:$4 sm:$0xff]  }
 0x1c2   :  { %v505_v42 = vpop.f32.mrf.mxu0 }
 0x1c3   :  { %v506_v56 = vadd.f32 %v505_v42, %v380_v49  ;;  %v511_v0 = vmax.f32 %v504_v54, 0.0  ;;  %v4135_v54 = vld [vmem:[%s5810_s2 + $0xf0] ss:$8 sps:$4 sm:$0xff]  }
 0x1c4   :  { %v507_v58 = vpop.f32.mrf.mxu0 }
 0x1c5   :  { %v508_v60 = vadd.f32 %v507_v58, %v384_v44  ;;  %v512_v62 = vmax.f32 %v506_v56, 0.0  ;;  %v4138_v58 = vld [vmem:[%s5810_s2 + $0xe0] ss:$8 sps:$4 sm:$0xff]  }
 0x1c7   :  { %v513_v55 = vmax.f32 %v508_v60, 0.0  ;;  %v514_v2 = vpack.c.bf16 %v512_v62, %v510_v51  ;;  %v4143_v60 = vld [vmem:[%s5810_s2 + $0xd4] ss:$8 sps:$4 sm:$0xff]   ;;  %v4141_v62 = vld [vmem:[%s5810_s2 + $0xd0] ss:$8 sps:$4 sm:$0xff]  }
 0x1c8   :  { %v4147_v51 = vld [vmem:[%s5810_s2 + $0xb0] ss:$8 sps:$4 sm:$0xff]  }
 0x1c9   :  { %v515_v53 = vpack.c.bf16 %v513_v55, %v511_v0  ;;  %v4146_v0 = vld [vmem:[%s5810_s2 + $0xc4] ss:$8 sps:$4 sm:$0xff]   ;;  %v4149_v55 = vld [vmem:[%s5810_s2 + $0xb4] ss:$8 sps:$4 sm:$0xff]  }
 0x1cb   :  { %752 = vmatprep.mubr.bf16.mxu1 %v515_v53  ;;  %v4152_v53 = vld [vmem:[%s5810_s2 + $0xa4] ss:$8 sps:$4 sm:$0xff]  }
 0x1cc   :  { %753 = vmatmul.mubr.bf16.vlgmr.msra.gmra.mxu1 %v514_v2  ;;  %v4150_v2 = vld [vmem:[%s5810_s2 + $0xa0] ss:$8 sps:$4 sm:$0xff]  }
 0x1cd   :  { %1229 = vmatpush1.bf16.msra.mxu1 %v4159_v8  ;;  %v4201_v8 = vld [vmem:[%s5812_s3 + $0x290] ss:$8 sps:$4 sm:$0xff]  }
 0x1ce   :  { %1230 = vmatprep.subr.bf16.mxu1 %v4164_v16  ;;  %v4204_v16 = vld [vmem:[%s5812_s3 + $0x280] ss:$8 sps:$4 sm:$0xff]  }
 0x1d1   :  { %1231 = vmatpush1.bf16.msra.mxu1 %v4162_v11  ;;  %v4207_v11 = vld [vmem:[%s5812_s3 + $0x370] ss:$8 sps:$4 sm:$0xff]  }
 0x1d2   :  { %1232 = vmatprep.subr.bf16.mxu1 %v4167_v13  ;;  %v4209_v13 = vld [vmem:[%s5812_s3 + $0x374] ss:$8 sps:$4 sm:$0xff]  }
 0x1d5   :  { %1233 = vmatpush1.bf16.msra.mxu1 %v4165_v46  ;;  %v4212_v46 = vld [vmem:[%s5812_s3 + $0x364] ss:$8 sps:$4 sm:$0xff]  }
 0x1d6   :  { %1234 = vmatprep.subr.bf16.mxu1 %v4170_v35  ;;  %v4210_v35 = vld [vmem:[%s5812_s3 + $0x360] ss:$8 sps:$4 sm:$0xff]  }
 0x1d9   :  { %1235 = vmatpush1.bf16.msra.mxu1 %v4168_v39  ;;  %v4215_v39 = vld [vmem:[%s5812_s3 + $0x354] ss:$8 sps:$4 sm:$0xff]  }
 0x1da   :  { %1236 = vmatprep.subr.bf16.mxu1 %v4173_v47  ;;  %v4213_v47 = vld [vmem:[%s5812_s3 + $0x350] ss:$8 sps:$4 sm:$0xff]  }
 0x1dd   :  { %1237 = vmatpush1.bf16.msra.mxu1 %v4171_v59  ;;  %v4218_v59 = vld [vmem:[%s5812_s3 + $0x344] ss:$8 sps:$4 sm:$0xff]  }
 0x1de   :  { %1238 = vmatprep.subr.bf16.mxu1 %v4176_v61  ;;  %v4216_v61 = vld [vmem:[%s5812_s3 + $0x340] ss:$8 sps:$4 sm:$0xff]  }
 0x1e1   :  { %1239 = vmatpush1.bf16.msra.mxu1 %v4174_v14  ;;  %v4221_v14 = vld [vmem:[%s5812_s3 + $0x334] ss:$8 sps:$4 sm:$0xff]  }
 0x1e2   :  { %1240 = vmatprep.subr.bf16.mxu1 %v4179_v63  ;;  %v4219_v63 = vld [vmem:[%s5812_s3 + $0x330] ss:$8 sps:$4 sm:$0xff]  }
 0x1e5   :  { %1241 = vmatpush1.bf16.msra.mxu1 %v4177_v15  ;;  %v4224_v15 = vld [vmem:[%s5812_s3 + $0x324] ss:$8 sps:$4 sm:$0xff]  }
 0x1e6   :  { %1242 = vmatprep.subr.bf16.mxu1 %v4182_v17  ;;  %v4222_v17 = vld [vmem:[%s5812_s3 + $0x320] ss:$8 sps:$4 sm:$0xff]  }
 0x1e9   :  { %1243 = vmatpush1.bf16.msra.mxu1 %v4180_v18  ;;  %v4227_v18 = vld [vmem:[%s5812_s3 + $0x314] ss:$8 sps:$4 sm:$0xff]  }
 0x1ea   :  { %1244 = vmatprep.subr.bf16.mxu1 %v4185_v23  ;;  %v4225_v23 = vld [vmem:[%s5812_s3 + $0x310] ss:$8 sps:$4 sm:$0xff]  }
 0x1ed   :  { %1245 = vmatpush2.bf16.msra.mxu1 %v4183_v5  ;;  %v4230_v5 = vld [vmem:[%s5812_s3 + $0x304] ss:$8 sps:$4 sm:$0xff]  }
 0x1ee   :  { %1246 = vmatprep.subr.bf16.mxu1 %v4188_v19  ;;  %v4228_v19 = vld [vmem:[%s5812_s3 + $0x300] ss:$8 sps:$4 sm:$0xff]  }
 0x1f1   :  { %1247 = vmatpush2.bf16.msra.mxu1 %v4186_v21  ;;  %v4233_v21 = vld [vmem:[%s5812_s3 + $0x3f4] ss:$8 sps:$4 sm:$0xff]  }
 0x1f2   :  { %1248 = vmatprep.subr.bf16.mxu1 %v4191_v22  ;;  %v4231_v22 = vld [vmem:[%s5812_s3 + $0x3f0] ss:$8 sps:$4 sm:$0xff]  }
 0x1f5   :  { %1249 = vmatpush2.bf16.msra.mxu1 %v4189_v24  ;;  %v4236_v24 = vld [vmem:[%s5812_s3 + $0x3e4] ss:$8 sps:$4 sm:$0xff]  }
 0x1f6   :  { %1250 = vmatprep.subr.bf16.mxu1 %v4194_v26  ;;  %v4234_v26 = vld [vmem:[%s5812_s3 + $0x3e0] ss:$8 sps:$4 sm:$0xff]  }
 0x1f9   :  { %1251 = vmatpush2.bf16.msra.mxu1 %v4192_v27  ;;  %v4239_v27 = vld [vmem:[%s5812_s3 + $0x3d4] ss:$8 sps:$4 sm:$0xff]  }
 0x1fa   :  { %1252 = vmatprep.subr.bf16.mxu1 %v4197_v30  ;;  %v4237_v30 = vld [vmem:[%s5812_s3 + $0x3d0] ss:$8 sps:$4 sm:$0xff]  }
 0x1fd   :  { %1253 = vmatpush2.bf16.msra.mxu1 %v4195_v57  ;;  %v4242_v57 = vld [vmem:[%s5812_s3 + $0x3c4] ss:$8 sps:$4 sm:$0xff]  }
 0x1fe   :  { %1254 = vmatprep.subr.bf16.mxu1 %v4200_v32  ;;  %v4266_v32 = vld [vmem:[%s5812_s3 + $0x444] ss:$8 sps:$4 sm:$0xff]  }
 0x201   :  { %1255 = vmatpush2.bf16.msra.mxu1 %v4198_v20  ;;  %v4264_v20 = vld [vmem:[%s5812_s3 + $0x440] ss:$8 sps:$4 sm:$0xff]  }
 0x202   :  { %1256 = vmatprep.subr.bf16.mxu1 %v4203_v7  ;;  %v4269_v7 = vld [vmem:[%s5812_s3 + $0x434] ss:$8 sps:$4 sm:$0xff]  }
 0x205   :  { %1257 = vmatpush2.bf16.msra.mxu1 %v4201_v8  ;;  %v4267_v8 = vld [vmem:[%s5812_s3 + $0x430] ss:$8 sps:$4 sm:$0xff]  }
 0x206   :  { %1258 = vmatprep.subr.bf16.mxu1 %v4206_v10  ;;  %v4272_v10 = vld [vmem:[%s5812_s3 + $0x424] ss:$8 sps:$4 sm:$0xff]  }
 0x209   :  { %1259 = vmatpush2.bf16.msra.mxu1 %v4204_v16  ;;  %v4270_v16 = vld [vmem:[%s5812_s3 + $0x420] ss:$8 sps:$4 sm:$0xff]  }
 0x28c   :  { %v754_v33 = vpop.f32.mrf.mxu1 }
 0x28d   :  { %v755_v41 = vadd.f32 %v754_v33, %v553_v36  ;;  %v4245_v33 = vld [vmem:[%s5812_s3 + $0x3b4] ss:$8 sps:$4 sm:$0xff]  }
 0x28e   :  { %v756_v37 = vpop.f32.mrf.mxu1 }
 0x28f   :  { %v757_v9 = vadd.f32 %v756_v37, %v557_v34  ;;  %v763_v50 = vmax.f32 %v755_v41, 0.0 }
 0x290   :  { %v758_v38 = vpop.f32.mrf.mxu1 }
 0x291   :  { %v759_v40 = vadd.f32 %v758_v38, %v553_v36  ;;  %v764_v44 = vmax.f32 %v757_v9, 0.0  ;;  %v802_v36 = vld [vmem:[%s5813_s7 + $0x4] sm:$0x3] }
 0x292   :  { %v760_v43 = vpop.f32.mrf.mxu1  ;;  %v811_v38 = vrot.slane %v802_v36, %v4621_v28  ;;  %v807_v9 = vrot.slane %v802_v36, %v4624_v29 }
 0x293   :  { %v761_v45 = vadd.f32 %v760_v43, %v557_v34  ;;  %v765_v48 = vmax.f32 %v759_v40, 0.0  ;;  %v4243_v34 = vld [vmem:[%s5812_s3 + $0x3b0] ss:$8 sps:$4 sm:$0xff]  }
 0x295   :  { %v766_v49 = vmax.f32 %v761_v45, 0.0  ;;  %v767_v56 = vpack.c.bf16 %v765_v48, %v763_v50 }
 0x297   :  { %v768_v42 = vpack.c.bf16 %v766_v49, %v764_v44 }
 0x299   :  { %1006 = vmatprep.mubr.bf16.mxu0 %v768_v42 }
 0x29a   :  { %1007 = vmatmul.mubr.bf16.vlgmr.msra.gmra.mxu0 %v767_v56 }
 0x29b   :  { %1408 = vmatpush1.bf16.msra.mxu0 %v4135_v54  ;;  %1439 = vmatprep.mubr.bf16.mxu0 %v4504_v1  ;;  %v4144_v1 = vld [vmem:[%s5810_s2 + $0xc0] ss:$8 sps:$4 sm:$0xff]  }
 0x29c   :  { %1409 = vmatprep.subr.bf16.mxu0 %v4140_v25 }
 0x29f   :  { %1410 = vmatpush1.bf16.msra.mxu0 %v4138_v58 }
 0x2a0   :  { %1411 = vmatprep.subr.bf16.mxu0 %v4143_v60  ;;  %v4248_v60 = vld [vmem:[%s5812_s3 + $0x3a4] ss:$8 sps:$4 sm:$0xff]  }
 0x2a3   :  { %1412 = vmatpush1.bf16.msra.mxu0 %v4141_v62  ;;  %v4246_v62 = vld [vmem:[%s5812_s3 + $0x3a0] ss:$8 sps:$4 sm:$0xff]  }
 0x2a4   :  { %1413 = vmatprep.subr.bf16.mxu0 %v4146_v0  ;;  %v4251_v0 = vld [vmem:[%s5812_s3 + $0x394] ss:$8 sps:$4 sm:$0xff]  }
 0x2a7   :  { %1414 = vmatpush1.bf16.msra.mxu0 %v4144_v1  ;;  %v4249_v1 = vld [vmem:[%s5812_s3 + $0x390] ss:$8 sps:$4 sm:$0xff]  }
 0x2a8   :  { %1415 = vmatprep.subr.bf16.mxu0 %v4149_v55  ;;  %v4254_v55 = vld [vmem:[%s5812_s3 + $0x384] ss:$8 sps:$4 sm:$0xff]  }
 0x2ab   :  { %1416 = vmatpush1.bf16.msra.mxu0 %v4147_v51  ;;  %v4252_v51 = vld [vmem:[%s5812_s3 + $0x380] ss:$8 sps:$4 sm:$0xff]  }
 0x2ac   :  { %1417 = vmatprep.subr.bf16.mxu0 %v4152_v53  ;;  %v4255_v53 = vld [vmem:[%s5812_s3 + $0x470] ss:$8 sps:$4 sm:$0xff]  }
 0x2af   :  { %1418 = vmatpush1.bf16.msra.mxu0 %v4150_v2  ;;  %v4257_v2 = vld [vmem:[%s5812_s3 + $0x474] ss:$8 sps:$4 sm:$0xff]  }
 0x2b0   :  { %1419 = vmatprep.subr.bf16.mxu0 %v4155_v52  ;;  %v4260_v52 = vld [vmem:[%s5812_s3 + $0x464] ss:$8 sps:$4 sm:$0xff]   ;;  %1880 = vmatprep.subr.bf16.mxu1 %v4257_v2  ;;  %v4321_v2 = vld [vmem:[%s5812_s3 + $0x510] ss:$8 sps:$4 sm:$0xff]  }
 0x2b3   :  { %1420 = vmatpush1.bf16.msra.mxu0 %v4153_v3  ;;  %v4258_v3 = vld [vmem:[%s5812_s3 + $0x460] ss:$8 sps:$4 sm:$0xff]  }
 0x2b4   :  { %1421 = vmatprep.subr.bf16.mxu0 %v4158_v4  ;;  %v4263_v4 = vld [vmem:[%s5812_s3 + $0x454] ss:$8 sps:$4 sm:$0xff]  }
 0x2b7   :  { %1422 = vmatpush1.bf16.msra.mxu0 %v4156_v6  ;;  %v4261_v6 = vld [vmem:[%s5812_s3 + $0x450] ss:$8 sps:$4 sm:$0xff]  }
 0x2b8   :  { %1610 = vmatprep.subr.bf16.mxu0 %v4209_v13  ;;  %v4273_v13 = vld [vmem:[%s5812_s3 + $0x410] ss:$8 sps:$4 sm:$0xff]  }
 0x2ba   :  { %1440 = vmatmul.mubr.bf16.vlgmr.msra.gmra.mxu0 %v4837_v12 }
 0x2bb   :  { %1611 = vmatpush1.bf16.msra.mxu0 %v4207_v11  ;;  %v4275_v11 = vld [vmem:[%s5812_s3 + $0x414] ss:$8 sps:$4 sm:$0xff]  }
 0x2bc   :  { %1612 = vmatprep.subr.bf16.mxu0 %v4212_v46  ;;  %v4278_v46 = vld [vmem:[%s5812_s3 + $0x404] ss:$8 sps:$4 sm:$0xff]  }
 0x2bf   :  { %1613 = vmatpush1.bf16.msra.mxu0 %v4210_v35  ;;  %v4276_v35 = vld [vmem:[%s5812_s3 + $0x400] ss:$8 sps:$4 sm:$0xff]  }
 0x2c0   :  { %1614 = vmatprep.subr.bf16.mxu0 %v4215_v39  ;;  %v4281_v39 = vld [vmem:[%s5812_s3 + $0x4f4] ss:$8 sps:$4 sm:$0xff]  }
 0x2c3   :  { %1615 = vmatpush1.bf16.msra.mxu0 %v4213_v47  ;;  %v4279_v47 = vld [vmem:[%s5812_s3 + $0x4f0] ss:$8 sps:$4 sm:$0xff]  }
 0x2c4   :  { %1616 = vmatprep.subr.bf16.mxu0 %v4218_v59  ;;  %v4284_v59 = vld [vmem:[%s5812_s3 + $0x4e4] ss:$8 sps:$4 sm:$0xff]  }
 0x2c7   :  { %1617 = vmatpush1.bf16.msra.mxu0 %v4216_v61  ;;  %v4282_v61 = vld [vmem:[%s5812_s3 + $0x4e0] ss:$8 sps:$4 sm:$0xff]  }
 0x2c8   :  { %1618 = vmatprep.subr.bf16.mxu0 %v4221_v14  ;;  %v4287_v14 = vld [vmem:[%s5812_s3 + $0x4d4] ss:$8 sps:$4 sm:$0xff]  }
 0x2cb   :  { %1619 = vmatpush1.bf16.msra.mxu0 %v4219_v63  ;;  %v4285_v63 = vld [vmem:[%s5812_s3 + $0x4d0] ss:$8 sps:$4 sm:$0xff]  }
 0x2cc   :  { %1620 = vmatprep.subr.bf16.mxu0 %v4224_v15  ;;  %v4290_v15 = vld [vmem:[%s5812_s3 + $0x4c4] ss:$8 sps:$4 sm:$0xff]  }
 0x2cf   :  { %1621 = vmatpush1.bf16.msra.mxu0 %v4222_v17  ;;  %v4288_v17 = vld [vmem:[%s5812_s3 + $0x4c0] ss:$8 sps:$4 sm:$0xff]  }
 0x2d0   :  { %1622 = vmatprep.subr.bf16.mxu0 %v4227_v18  ;;  %v1056_v18 = vld [vmem:[%s5813_s7 + $0x6] sm:$0x3] }
 0x2d3   :  { %1623 = vmatpush1.bf16.msra.mxu0 %v4225_v23 }
 0x2d4   :  { %1624 = vmatprep.subr.bf16.mxu0 %v4230_v5  ;;  %v1065_v5 = vrot.slane %v1056_v18, %v4621_v28 }
 0x2d7   :  { %1625 = vmatpush1.bf16.msra.mxu0 %v4228_v19  ;;  %v1061_v19 = vrot.slane %v1056_v18, %v4624_v29 }
 0x2d8   :  { %1626 = vmatprep.subr.bf16.mxu0 %v4233_v21 }
 0x2db   :  { %1627 = vmatpush2.bf16.msra.mxu0 %v4231_v22 }
 0x2dc   :  { %1628 = vmatprep.subr.bf16.mxu0 %v4236_v24 }
 0x2df   :  { %1629 = vmatpush2.bf16.msra.mxu0 %v4234_v26 }
 0x2e0   :  { %1630 = vmatprep.subr.bf16.mxu0 %v4239_v27 }
 0x2e3   :  { %1631 = vmatpush2.bf16.msra.mxu0 %v4237_v30 }
 0x2e4   :  { %1632 = vmatprep.subr.bf16.mxu0 %v4242_v57 }
 0x2e7   :  { %1633 = vmatpush2.bf16.msra.mxu0 %v4240_v31 }
 0x2e8   :  { %1634 = vmatprep.subr.bf16.mxu0 %v4245_v33 }
 0x2eb   :  { %1635 = vmatpush2.bf16.msra.mxu0 %v4243_v34 }
 0x2ec   :  { %1636 = vmatprep.subr.bf16.mxu0 %v4248_v60  ;;  %v4314_v60 = vld [vmem:[%s5812_s3 + $0x544] ss:$8 sps:$4 sm:$0xff]  }
 0x2ef   :  { %1637 = vmatpush2.bf16.msra.mxu0 %v4246_v62  ;;  %v4312_v62 = vld [vmem:[%s5812_s3 + $0x540] ss:$8 sps:$4 sm:$0xff]  }
 0x2f0   :  { %1638 = vmatprep.subr.bf16.mxu0 %v4251_v0  ;;  %v4317_v0 = vld [vmem:[%s5812_s3 + $0x534] ss:$8 sps:$4 sm:$0xff]  }
 0x2f3   :  { %1639 = vmatpush2.bf16.msra.mxu0 %v4249_v1  ;;  %v4315_v1 = vld [vmem:[%s5812_s3 + $0x530] ss:$8 sps:$4 sm:$0xff]  }
 0x2f4   :  { %1640 = vmatprep.subr.bf16.mxu0 %v4254_v55  ;;  %v4320_v55 = vld [vmem:[%s5812_s3 + $0x524] ss:$8 sps:$4 sm:$0xff]  }
 0x2f7   :  { %1641 = vmatpush2.bf16.msra.mxu0 %v4252_v51  ;;  %v4318_v51 = vld [vmem:[%s5812_s3 + $0x520] ss:$8 sps:$4 sm:$0xff]  }
 0x35a   :  { %v1008_v37 = vpop.f32.mrf.mxu0 }
 0x35b   :  { %v1009_v48 = vadd.f32 %v1008_v37, %v807_v9 }
 0x35c   :  { %v1010_v40 = vpop.f32.mrf.mxu0 }
 0x35d   :  { %v1011_v43 = vadd.f32 %v1010_v40, %v811_v38  ;;  %v1017_v56 = vmax.f32 %v1009_v48, 0.0  ;;  %v4291_v40 = vld [vmem:[%s5812_s3 + $0x4b0] ss:$8 sps:$4 sm:$0xff]  }
 0x35e   :  { %v1012_v41 = vpop.f32.mrf.mxu0  ;;  %v4297_v48 = vld [vmem:[%s5812_s3 + $0x490] ss:$8 sps:$4 sm:$0xff]  }
 0x35f   :  { %v1013_v45 = vadd.f32 %v1012_v41, %v807_v9  ;;  %v1018_v42 = vmax.f32 %v1011_v43, 0.0  ;;  %v4293_v9 = vld [vmem:[%s5812_s3 + $0x4b4] ss:$8 sps:$4 sm:$0xff]   ;;  %v4296_v41 = vld [vmem:[%s5812_s3 + $0x4a4] ss:$8 sps:$4 sm:$0xff]  }
 0x360   :  { %v1014_v44 = vpop.f32.mrf.mxu0  ;;  %v4294_v43 = vld [vmem:[%s5812_s3 + $0x4a0] ss:$8 sps:$4 sm:$0xff]  }
 0x361   :  { %v1015_v49 = vadd.f32 %v1014_v44, %v811_v38  ;;  %v1019_v50 = vmax.f32 %v1013_v45, 0.0  ;;  %v4299_v45 = vld [vmem:[%s5812_s3 + $0x494] ss:$8 sps:$4 sm:$0xff]   ;;  %v4300_v44 = vld [vmem:[%s5812_s3 + $0x480] ss:$8 sps:$4 sm:$0xff]  }
 0x363   :  { %v1020_v54 = vmax.f32 %v1015_v49, 0.0  ;;  %v1021_v58 = vpack.c.bf16 %v1019_v50, %v1017_v56  ;;  %v4302_v49 = vld [vmem:[%s5812_s3 + $0x484] ss:$8 sps:$4 sm:$0xff]   ;;  %v4303_v50 = vld [vmem:[%s5812_s3 + $0x570] ss:$8 sps:$4 sm:$0xff]  }
 0x364   :  { %v4306_v56 = vld [vmem:[%s5812_s3 + $0x560] ss:$8 sps:$4 sm:$0xff]  }
 0x365   :  { %v1022_v25 = vpack.c.bf16 %v1020_v54, %v1018_v42  ;;  %v4305_v42 = vld [vmem:[%s5812_s3 + $0x574] ss:$8 sps:$4 sm:$0xff]   ;;  %v4308_v54 = vld [vmem:[%s5812_s3 + $0x564] ss:$8 sps:$4 sm:$0xff]  }
 0x366   :  { %2134 = vmatprep.subr.bf16.mxu0 %v4305_v42  ;;  %v4357_v42 = vld [vmem:[%s5812_s3 + $0x650] ss:$8 sps:$4 sm:$0xff]  }
 0x367   :  { %1260 = vmatprep.mubr.bf16.mxu1 %v1022_v25  ;;  %v4311_v25 = vld [vmem:[%s5812_s3 + $0x554] ss:$8 sps:$4 sm:$0xff]  }
 0x368   :  { %1261 = vmatmul.mubr.bf16.vlgmr.msra.gmra.mxu1 %v1021_v58  ;;  %v4309_v58 = vld [vmem:[%s5812_s3 + $0x550] ss:$8 sps:$4 sm:$0xff]  }
 0x369   :  { %1881 = vmatpush1.bf16.msra.mxu1 %v4255_v53  ;;  %v4323_v53 = vld [vmem:[%s5812_s3 + $0x514] ss:$8 sps:$4 sm:$0xff]  }
 0x36a   :  { %1882 = vmatprep.subr.bf16.mxu1 %v4260_v52  ;;  %v4326_v52 = vld [vmem:[%s5812_s3 + $0x504] ss:$8 sps:$4 sm:$0xff]  }
 0x36d   :  { %1883 = vmatpush1.bf16.msra.mxu1 %v4258_v3  ;;  %v4324_v3 = vld [vmem:[%s5812_s3 + $0x500] ss:$8 sps:$4 sm:$0xff]  }
 0x36e   :  { %1884 = vmatprep.subr.bf16.mxu1 %v4263_v4  ;;  %v4329_v4 = vld [vmem:[%s5812_s3 + $0x5f4] ss:$8 sps:$4 sm:$0xff]  }
 0x371   :  { %1885 = vmatpush1.bf16.msra.mxu1 %v4261_v6  ;;  %v4327_v6 = vld [vmem:[%s5812_s3 + $0x5f0] ss:$8 sps:$4 sm:$0xff]  }
 0x372   :  { %1886 = vmatprep.subr.bf16.mxu1 %v4266_v32  ;;  %v4332_v32 = vld [vmem:[%s5812_s3 + $0x5e4] ss:$8 sps:$4 sm:$0xff]  }
 0x375   :  { %1887 = vmatpush1.bf16.msra.mxu1 %v4264_v20  ;;  %v4330_v20 = vld [vmem:[%s5812_s3 + $0x5e0] ss:$8 sps:$4 sm:$0xff]  }
 0x376   :  { %1888 = vmatprep.subr.bf16.mxu1 %v4269_v7  ;;  %v4335_v7 = vld [vmem:[%s5812_s3 + $0x5d4] ss:$8 sps:$4 sm:$0xff]  }
 0x379   :  { %1889 = vmatpush1.bf16.msra.mxu1 %v4267_v8  ;;  %v4333_v8 = vld [vmem:[%s5812_s3 + $0x5d0] ss:$8 sps:$4 sm:$0xff]  }
 0x37a   :  { %1890 = vmatprep.subr.bf16.mxu1 %v4272_v10  ;;  %v4338_v10 = vld [vmem:[%s5812_s3 + $0x5c4] ss:$8 sps:$4 sm:$0xff]  }
 0x37d   :  { %1891 = vmatpush1.bf16.msra.mxu1 %v4270_v16  ;;  %v4336_v16 = vld [vmem:[%s5812_s3 + $0x5c0] ss:$8 sps:$4 sm:$0xff]  }
 0x37e   :  { %1892 = vmatprep.subr.bf16.mxu1 %v4275_v11  ;;  %v4341_v11 = vld [vmem:[%s5812_s3 + $0x5b4] ss:$8 sps:$4 sm:$0xff]  }
 0x381   :  { %1893 = vmatpush1.bf16.msra.mxu1 %v4273_v13  ;;  %v4339_v13 = vld [vmem:[%s5812_s3 + $0x5b0] ss:$8 sps:$4 sm:$0xff]  }
 0x382   :  { %1894 = vmatprep.subr.bf16.mxu1 %v4278_v46  ;;  %v1441_v46 = vpop.f32.mrf.mxu0 }
 0x385   :  { %1895 = vmatpush1.bf16.msra.mxu1 %v4276_v35  ;;  %v1443_v35 = vpop.f32.mrf.mxu0 }
 0x386   :  { %1896 = vmatprep.subr.bf16.mxu1 %v4281_v39 }
 0x387   :  { %v1445_v39 = vpop.f32.mrf.mxu0 }
 0x389   :  { %1897 = vmatpush2.bf16.msra.mxu1 %v4279_v47  ;;  %v1447_v47 = vpop.f32.mrf.mxu0 }
 0x38a   :  { %1898 = vmatprep.subr.bf16.mxu1 %v4284_v59 }
 0x38d   :  { %1899 = vmatpush2.bf16.msra.mxu1 %v4282_v61  ;;  %v1653_v61 = vld [vmem:[%s5813_s7 + $0x8] sm:$0x3] }
 0x38e   :  { %1900 = vmatprep.subr.bf16.mxu1 %v4287_v14  ;;  %v1658_v18 = vrot.slane %v1653_v61, %v4624_v29 }
 0x391   :  { %1901 = vmatpush2.bf16.msra.mxu1 %v4285_v63 }
 0x392   :  { %1902 = vmatprep.subr.bf16.mxu1 %v4290_v15  ;;  %v1662_v15 = vrot.slane %v1653_v61, %v4621_v28 }
 0x395   :  { %1903 = vmatpush2.bf16.msra.mxu1 %v4288_v17 }
 0x396   :  { %1904 = vmatprep.subr.bf16.mxu1 %v4293_v9  ;;  %v4347_v9 = vld [vmem:[%s5812_s3 + $0x594] ss:$8 sps:$4 sm:$0xff]  }
 0x399   :  { %1905 = vmatpush2.bf16.msra.mxu1 %v4291_v40  ;;  %v4345_v40 = vld [vmem:[%s5812_s3 + $0x590] ss:$8 sps:$4 sm:$0xff]  }
 0x39a   :  { %1906 = vmatprep.subr.bf16.mxu1 %v4296_v41  ;;  %v4350_v41 = vld [vmem:[%s5812_s3 + $0x584] ss:$8 sps:$4 sm:$0xff]  }
 0x39d   :  { %1907 = vmatpush2.bf16.msra.mxu1 %v4294_v43  ;;  %v4348_v43 = vld [vmem:[%s5812_s3 + $0x580] ss:$8 sps:$4 sm:$0xff]  }
 0x39e   :  { %1908 = vmatprep.subr.bf16.mxu1 %v4299_v45  ;;  %v4351_v45 = vld [vmem:[%s5812_s3 + $0x670] ss:$8 sps:$4 sm:$0xff]  }
 0x3a1   :  { %1909 = vmatpush2.bf16.msra.mxu1 %v4297_v48  ;;  %v4353_v48 = vld [vmem:[%s5812_s3 + $0x674] ss:$8 sps:$4 sm:$0xff]  }
 0x3a2   :  { %1910 = vmatprep.subr.bf16.mxu1 %v4302_v49  ;;  %v4354_v49 = vld [vmem:[%s5812_s3 + $0x660] ss:$8 sps:$4 sm:$0xff]  }
 0x3a5   :  { %1911 = vmatpush2.bf16.msra.mxu1 %v4300_v44  ;;  %v4356_v44 = vld [vmem:[%s5812_s3 + $0x664] ss:$8 sps:$4 sm:$0xff]  }
 0x3a6   :  { %2388 = vmatprep.subr.bf16.mxu1 %v4353_v48  ;;  %v4427_v48 = vld [vmem:[%s5815_s4 + $0x14] ss:$8 sps:$4 sm:$0xff]  }
 0x428   :  { %v1262_v23 = vpop.f32.mrf.mxu1 }
 0x429   :  { %v1263_v27 = vadd.f32 %v1262_v23, %v1061_v19 }
 0x42a   :  { %v1264_v21 = vpop.f32.mrf.mxu1 }
 0x42b   :  { %v1265_v24 = vadd.f32 %v1264_v21, %v1065_v5  ;;  %v1271_v36 = vmax.f32 %v1263_v27, 0.0 }
 0x42c   :  { %v1266_v22 = vpop.f32.mrf.mxu1 }
 0x42d   :  { %v1267_v26 = vadd.f32 %v1266_v22, %v1061_v19  ;;  %v1272_v33 = vmax.f32 %v1265_v24, 0.0 }
 0x42e   :  { %v1268_v30 = vpop.f32.mrf.mxu1 }
 0x42f   :  { %v1269_v57 = vadd.f32 %v1268_v30, %v1065_v5  ;;  %v1273_v31 = vmax.f32 %v1267_v26, 0.0 }
 0x431   :  { %v1274_v34 = vmax.f32 %v1269_v57, 0.0  ;;  %v1275_v38 = vpack.c.bf16 %v1273_v31, %v1271_v36 }
 0x433   :  { %v1276_v37 = vpack.c.bf16 %v1274_v34, %v1272_v33 }
 0x435   :  { %1642 = vmatprep.mubr.bf16.mxu0 %v1276_v37  ;;  %v4344_v37 = vld [vmem:[%s5812_s3 + $0x5a4] ss:$8 sps:$4 sm:$0xff]  }
 0x436   :  { %1643 = vmatmul.mubr.bf16.vlgmr.msra.gmra.mxu0 %v1275_v38  ;;  %v4342_v38 = vld [vmem:[%s5812_s3 + $0x5a0] ss:$8 sps:$4 sm:$0xff]  }
 0x437   :  { %2135 = vmatpush1.bf16.msra.mxu0 %v4303_v50  ;;  %v4359_v50 = vld [vmem:[%s5812_s3 + $0x654] ss:$8 sps:$4 sm:$0xff]  }
 0x438   :  { %2136 = vmatprep.subr.bf16.mxu0 %v4308_v54  ;;  %v4362_v54 = vld [vmem:[%s5812_s3 + $0x644] ss:$8 sps:$4 sm:$0xff]  }
 0x43b   :  { %2137 = vmatpush1.bf16.msra.mxu0 %v4306_v56  ;;  %v4360_v56 = vld [vmem:[%s5812_s3 + $0x640] ss:$8 sps:$4 sm:$0xff]  }
 0x43c   :  { %2138 = vmatprep.subr.bf16.mxu0 %v4311_v25  ;;  %v4365_v25 = vld [vmem:[%s5812_s3 + $0x634] ss:$8 sps:$4 sm:$0xff]  }
 0x43f   :  { %2139 = vmatpush1.bf16.msra.mxu0 %v4309_v58  ;;  %v4363_v58 = vld [vmem:[%s5812_s3 + $0x630] ss:$8 sps:$4 sm:$0xff]  }
 0x440   :  { %2140 = vmatprep.subr.bf16.mxu0 %v4314_v60  ;;  %v4368_v60 = vld [vmem:[%s5812_s3 + $0x624] ss:$8 sps:$4 sm:$0xff]  }
 0x443   :  { %2141 = vmatpush1.bf16.msra.mxu0 %v4312_v62  ;;  %v4366_v62 = vld [vmem:[%s5812_s3 + $0x620] ss:$8 sps:$4 sm:$0xff]  }
 0x444   :  { %2142 = vmatprep.subr.bf16.mxu0 %v4317_v0  ;;  %v4371_v0 = vld [vmem:[%s5812_s3 + $0x614] ss:$8 sps:$4 sm:$0xff]  }
 0x447   :  { %2143 = vmatpush1.bf16.msra.mxu0 %v4315_v1  ;;  %v4369_v1 = vld [vmem:[%s5812_s3 + $0x610] ss:$8 sps:$4 sm:$0xff]  }
 0x448   :  { %2144 = vmatprep.subr.bf16.mxu0 %v4320_v55  ;;  %v4374_v55 = vld [vmem:[%s5812_s3 + $0x604] ss:$8 sps:$4 sm:$0xff]  }
 0x44b   :  { %2145 = vmatpush1.bf16.msra.mxu0 %v4318_v51  ;;  %v4372_v51 = vld [vmem:[%s5812_s3 + $0x600] ss:$8 sps:$4 sm:$0xff]  }
 0x44c   :  { %2146 = vmatprep.subr.bf16.mxu0 %v4323_v53  ;;  %v4377_v53 = vld [vmem:[%s5812_s3 + $0x6f4] ss:$8 sps:$4 sm:$0xff]  }
 0x44f   :  { %2147 = vmatpush1.bf16.msra.mxu0 %v4321_v2  ;;  %v4375_v2 = vld [vmem:[%s5812_s3 + $0x6f0] ss:$8 sps:$4 sm:$0xff]  }
 0x450   :  { %2148 = vmatprep.subr.bf16.mxu0 %v4326_v52  ;;  %v4380_v52 = vld [vmem:[%s5812_s3 + $0x6e4] ss:$8 sps:$4 sm:$0xff]  }
 0x453   :  { %2149 = vmatpush1.bf16.msra.mxu0 %v4324_v3  ;;  %v4378_v3 = vld [vmem:[%s5812_s3 + $0x6e0] ss:$8 sps:$4 sm:$0xff]  }
 0x454   :  { %2150 = vmatprep.subr.bf16.mxu0 %v4329_v4  ;;  %v4383_v4 = vld [vmem:[%s5812_s3 + $0x6d4] ss:$8 sps:$4 sm:$0xff]  }
 0x457   :  { %2151 = vmatpush2.bf16.msra.mxu0 %v4327_v6  ;;  %v4381_v6 = vld [vmem:[%s5812_s3 + $0x6d0] ss:$8 sps:$4 sm:$0xff]  }
 0x458   :  { %2152 = vmatprep.subr.bf16.mxu0 %v4332_v32  ;;  %v4386_v32 = vld [vmem:[%s5812_s3 + $0x6c4] ss:$8 sps:$4 sm:$0xff]  }
 0x45b   :  { %2153 = vmatpush2.bf16.msra.mxu0 %v4330_v20  ;;  %v4384_v20 = vld [vmem:[%s5812_s3 + $0x6c0] ss:$8 sps:$4 sm:$0xff]  }
 0x45c   :  { %2154 = vmatprep.subr.bf16.mxu0 %v4335_v7  ;;  %v4389_v7 = vld [vmem:[%s5812_s3 + $0x6b4] ss:$8 sps:$4 sm:$0xff]  }
 0x45f   :  { %2155 = vmatpush2.bf16.msra.mxu0 %v4333_v8  ;;  %v4387_v8 = vld [vmem:[%s5812_s3 + $0x6b0] ss:$8 sps:$4 sm:$0xff]  }
 0x460   :  { %2156 = vmatprep.subr.bf16.mxu0 %v4338_v10  ;;  %v1708_v10 = vld [vmem:[%s5813_s7 + $0xa] sm:$0x3] }
 0x463   :  { %2157 = vmatpush2.bf16.msra.mxu0 %v4336_v16 }
 0x464   :  { %2158 = vmatprep.subr.bf16.mxu0 %v4341_v11  ;;  %v1717_v11 = vrot.slane %v1708_v10, %v4621_v28 }
 0x467   :  { %2159 = vmatpush2.bf16.msra.mxu0 %v4339_v13  ;;  %v1713_v13 = vrot.slane %v1708_v10, %v4624_v29 }
 0x468   :  { %2160 = vmatprep.subr.bf16.mxu0 %v4344_v37  ;;  %v4413_v37 = vld [vmem:[%s5815_s4 + $0x50] ss:$8 sps:$4 sm:$0xff]  }
 0x46b   :  { %2161 = vmatpush2.bf16.msra.mxu0 %v4342_v38  ;;  %v4418_v38 = vld [vmem:[%s5815_s4 + $0x44] ss:$8 sps:$4 sm:$0xff]  }
 0x46c   :  { %2162 = vmatprep.subr.bf16.mxu0 %v4347_v9  ;;  %v4416_v9 = vld [vmem:[%s5815_s4 + $0x40] ss:$8 sps:$4 sm:$0xff]  }
 0x46f   :  { %2163 = vmatpush2.bf16.msra.mxu0 %v4345_v40  ;;  %v4421_v40 = vld [vmem:[%s5815_s4 + $0x34] ss:$8 sps:$4 sm:$0xff]  }
 0x470   :  { %2164 = vmatprep.subr.bf16.mxu0 %v4350_v41  ;;  %v4419_v41 = vld [vmem:[%s5815_s4 + $0x30] ss:$8 sps:$4 sm:$0xff]  }
 0x473   :  { %2165 = vmatpush2.bf16.msra.mxu0 %v4348_v43  ;;  %v4424_v43 = vld [vmem:[%s5815_s4 + $0x24] ss:$8 sps:$4 sm:$0xff]  }
 0x4f6   :  { %v1644_v59 = vpop.f32.mrf.mxu0 }
 0x4f7   :  { %v1645_v17 = vadd.f32 %v1644_v59, %v1441_v46 }
 0x4f8   :  { %v1646_v14 = vpop.f32.mrf.mxu0 }
 0x4f9   :  { %v1647_v63 = vadd.f32 %v1646_v14, %v1443_v35  ;;  %v1665_v26 = vadd.f32 %v1658_v18, %v1645_v17 }
 0x4fa   :  { %v1648_v23 = vpop.f32.mrf.mxu0 }
 0x4fb   :  { %v1649_v5 = vadd.f32 %v1648_v23, %v1445_v39  ;;  %v1666_v21 = vadd.f32 %v1662_v15, %v1647_v63  ;;  %v1669_v33 = vmax.f32 %v1665_v26, 0.0  ;;  %v4398_v26 = vld [vmem:[%s5812_s3 + $0x684] ss:$8 sps:$4 sm:$0xff]  }
 0x4fc   :  { %v1650_v19 = vpop.f32.mrf.mxu0 }
 0x4fd   :  { %v1667_v22 = vadd.f32 %v1658_v18, %v1649_v5  ;;  %v1651_v24 = vadd.f32 %v1650_v19, %v1447_v47  ;;  %v1670_v57 = vmax.f32 %v1666_v21, 0.0  ;;  %v4392_v19 = vld [vmem:[%s5812_s3 + $0x6a4] ss:$8 sps:$4 sm:$0xff]   ;;  %v4390_v21 = vld [vmem:[%s5812_s3 + $0x6a0] ss:$8 sps:$4 sm:$0xff]  }
 0x4ff   :  { %v1668_v27 = vadd.f32 %v1662_v15, %v1651_v24  ;;  %v1671_v30 = vmax.f32 %v1667_v22, 0.0  ;;  %v4395_v22 = vld [vmem:[%s5812_s3 + $0x694] ss:$8 sps:$4 sm:$0xff]   ;;  %v4393_v24 = vld [vmem:[%s5812_s3 + $0x690] ss:$8 sps:$4 sm:$0xff]  }
 0x501   :  { %v1672_v31 = vmax.f32 %v1668_v27, 0.0  ;;  %v1673_v36 = vpack.c.bf16 %v1671_v30, %v1669_v33  ;;  %v4396_v27 = vld [vmem:[%s5812_s3 + $0x680] ss:$8 sps:$4 sm:$0xff]   ;;  %v4515_v30 = vmov 0.0   ;;  %v4412_v33 = vld [vmem:[%s5815_s4 + $0x64] ss:$8 sps:$4 sm:$0xff]  }
 0x503   :  { %v1674_v34 = vpack.c.bf16 %v1672_v31, %v1670_v57  ;;  %v4407_v57 = vld [vmem:[%s5815_s4 + $0x70] ss:$8 sps:$4 sm:$0xff]   ;;  %v4409_v31 = vld [vmem:[%s5815_s4 + $0x74] ss:$8 sps:$4 sm:$0xff]  }
 0x504   :  { %2641 = vmatprep.subr.bf16.mxu0 %v4409_v31  ;;  %v4460_v31 = vld [vmem:[%s5816_s5 + $0x28] sm:$0xff]  }
 0x505   :  { %1912 = vmatprep.mubr.bf16.mxu1 %v1674_v34  ;;  %v4410_v34 = vld [vmem:[%s5815_s4 + $0x60] ss:$8 sps:$4 sm:$0xff]  }
 0x506   :  { %1913 = vmatmul.mubr.bf16.vlgmr.msra.gmra.mxu1 %v1673_v36  ;;  %v4415_v36 = vld [vmem:[%s5815_s4 + $0x54] ss:$8 sps:$4 sm:$0xff]  }
 0x507   :  { %2389 = vmatpush1.bf16.msra.mxu1 %v4351_v45  ;;  %v4422_v45 = vld [vmem:[%s5815_s4 + $0x20] ss:$8 sps:$4 sm:$0xff]  }
 0x508   :  { %2390 = vmatprep.subr.bf16.mxu1 %v4356_v44  ;;  %v4425_v44 = vld [vmem:[%s5815_s4 + $0x10] ss:$8 sps:$4 sm:$0xff]  }
 0x50b   :  { %2391 = vmatpush1.bf16.msra.mxu1 %v4354_v49  ;;  %v4430_v49 = vld [vmem:[%s5815_s4 + $0x4] ss:$8 sps:$4 sm:$0xff]  }
 0x50c   :  { %2392 = vmatprep.subr.bf16.mxu1 %v4359_v50  ;;  %v4428_v50 = vld [vmem:[%s5815_s4] ss:$8 sps:$4 sm:$0xff]  }
 0x50f   :  { %2393 = vmatpush1.bf16.msra.mxu1 %v4357_v42  ;;  %v4433_v42 = vld [vmem:[%s5815_s4 + $0xf4] ss:$8 sps:$4 sm:$0xff]  }
 0x510   :  { %2394 = vmatprep.subr.bf16.mxu1 %v4362_v54  ;;  %v4431_v54 = vld [vmem:[%s5815_s4 + $0xf0] ss:$8 sps:$4 sm:$0xff]  }
 0x513   :  { %2395 = vmatpush1.bf16.msra.mxu1 %v4360_v56  ;;  %v4436_v56 = vld [vmem:[%s5815_s4 + $0xe4] ss:$8 sps:$4 sm:$0xff]  }
 0x514   :  { %2396 = vmatprep.subr.bf16.mxu1 %v4365_v25  ;;  %v4434_v25 = vld [vmem:[%s5815_s4 + $0xe0] ss:$8 sps:$4 sm:$0xff]  }
 0x517   :  { %2397 = vmatpush1.bf16.msra.mxu1 %v4363_v58  ;;  %v4439_v58 = vld [vmem:[%s5815_s4 + $0xd4] ss:$8 sps:$4 sm:$0xff]  }
 0x518   :  { %2398 = vmatprep.subr.bf16.mxu1 %v4368_v60  ;;  %v4437_v60 = vld [vmem:[%s5815_s4 + $0xd0] ss:$8 sps:$4 sm:$0xff]  }
 0x51b   :  { %2399 = vmatpush1.bf16.msra.mxu1 %v4366_v62  ;;  %v4442_v62 = vld [vmem:[%s5815_s4 + $0xc4] ss:$8 sps:$4 sm:$0xff]  }
 0x51c   :  { %2400 = vmatprep.subr.bf16.mxu1 %v4371_v0  ;;  %v4440_v0 = vld [vmem:[%s5815_s4 + $0xc0] ss:$8 sps:$4 sm:$0xff]  }
 0x51f   :  { %2401 = vmatpush1.bf16.msra.mxu1 %v4369_v1  ;;  %v4445_v1 = vld [vmem:[%s5815_s4 + $0xb4] ss:$8 sps:$4 sm:$0xff]  }
 0x520   :  { %2402 = vmatprep.subr.bf16.mxu1 %v4374_v55  ;;  %v4443_v55 = vld [vmem:[%s5815_s4 + $0xb0] ss:$8 sps:$4 sm:$0xff]  }
 0x523   :  { %2403 = vmatpush1.bf16.msra.mxu1 %v4372_v51  ;;  %v1962_v51 = vld [vmem:[%s5813_s7 + $0xc] sm:$0x3] }
 0x524   :  { %2404 = vmatprep.subr.bf16.mxu1 %v4377_v53 }
 0x527   :  { %2405 = vmatpush2.bf16.msra.mxu1 %v4375_v2  ;;  %v1971_v2 = vrot.slane %v1962_v51, %v4621_v28 }
 0x528   :  { %2406 = vmatprep.subr.bf16.mxu1 %v4380_v52  ;;  %v1967_v52 = vrot.slane %v1962_v51, %v4624_v29 }
 0x52b   :  { %2407 = vmatpush2.bf16.msra.mxu1 %v4378_v3 }
 0x52c   :  { %2408 = vmatprep.subr.bf16.mxu1 %v4383_v4 }
 0x52f   :  { %2409 = vmatpush2.bf16.msra.mxu1 %v4381_v6 }
 0x530   :  { %2410 = vmatprep.subr.bf16.mxu1 %v4386_v32 }
 0x533   :  { %2411 = vmatpush2.bf16.msra.mxu1 %v4384_v20 }
 0x534   :  { %2412 = vmatprep.subr.bf16.mxu1 %v4389_v7 }
 0x537   :  { %2413 = vmatpush2.bf16.msra.mxu1 %v4387_v8 }
 0x538   :  { %2414 = vmatprep.subr.bf16.mxu1 %v4392_v19  ;;  %v4449_v19 = vld [vmem:[%s5815_s4 + $0x90] ss:$8 sps:$4 sm:$0xff]  }
 0x53b   :  { %2415 = vmatpush2.bf16.msra.mxu1 %v4390_v21  ;;  %v4452_v21 = vld [vmem:[%s5815_s4 + $0x80] ss:$8 sps:$4 sm:$0xff]  }
 0x53c   :  { %2416 = vmatprep.subr.bf16.mxu1 %v4395_v22  ;;  %v4455_v22 = vld [vmem:[%s5816_s5 + $0x78] sm:$0xff]  }
 0x53f   :  { %2417 = vmatpush2.bf16.msra.mxu1 %v4393_v24  ;;  %v4456_v24 = vld [vmem:[%s5816_s5 + $0x38] sm:$0xff]  }
 0x540   :  { %2418 = vmatprep.subr.bf16.mxu1 %v4398_v26  ;;  %v4457_v26 = vld [vmem:[%s5816_s5 + $0x70] sm:$0xff]  }
 0x543   :  { %2419 = vmatpush2.bf16.msra.mxu1 %v4396_v27  ;;  %v4458_v27 = vld [vmem:[%s5816_s5 + $0x30] sm:$0xff]  }
 0x544   :  { %3944 = vmatprep.subr.bf16.mxu1 %v4515_v30 }
 0x5c6   :  { %v1914_v16 = vpop.f32.mrf.mxu1 }
 0x5c7   :  { %v1915_v59 = vadd.f32 %v1914_v16, %v1713_v13 }
 0x5c8   :  { %v1916_v46 = vpop.f32.mrf.mxu1 }
 0x5c9   :  { %v1917_v39 = vadd.f32 %v1916_v46, %v1717_v11  ;;  %v1923_v18 = vmax.f32 %v1915_v59, 0.0  ;;  %v4401_v59 = vld [vmem:[%s5814_s6 + $0x28] sm:$0xff]  }
 0x5ca   :  { %v1918_v35 = vpop.f32.mrf.mxu1 }
 0x5cb   :  { %v1919_v47 = vadd.f32 %v1918_v35, %v1713_v13  ;;  %v1924_v15 = vmax.f32 %v1917_v39, 0.0  ;;  %v4399_v35 = vld [vmem:[%s5814_s6 + $0x38] sm:$0xff]  }
 0x5cc   :  { %v1920_v61 = vpop.f32.mrf.mxu1 }
 0x5cd   :  { %v1921_v14 = vadd.f32 %v1920_v61, %v1717_v11  ;;  %v1925_v63 = vmax.f32 %v1919_v47, 0.0  ;;  %v4400_v47 = vld [vmem:[%s5814_s6 + $0x30] sm:$0xff]   ;;  %v4402_v61 = vld [vmem:[%s5814_s6 + $0x20] sm:$0xff]  }
 0x5cf   :  { %v1926_v17 = vmax.f32 %v1921_v14, 0.0  ;;  %v1927_v5 = vpack.c.bf16 %v1925_v63, %v1923_v18  ;;  %v4403_v14 = vld [vmem:[%s5814_s6 + $0x18] sm:$0xff]   ;;  %v4404_v63 = vld [vmem:[%s5814_s6 + $0x10] sm:$0xff]   ;;  %v4448_v18 = vld [vmem:[%s5815_s4 + $0xa4] ss:$8 sps:$4 sm:$0xff]  }
 0x5d1   :  { %v1928_v23 = vpack.c.bf16 %v1926_v17, %v1924_v15  ;;  %v4405_v15 = vld [vmem:[%s5814_s6 + $0x8] sm:$0xff]   ;;  %v4406_v17 = vld [vmem:[%s5814_s6] sm:$0xff]  }
 0x5d3   :  { %2166 = vmatprep.mubr.bf16.mxu0 %v1928_v23  ;;  %v4446_v23 = vld [vmem:[%s5815_s4 + $0xa0] ss:$8 sps:$4 sm:$0xff]  }
 0x5d4   :  { %2167 = vmatmul.mubr.bf16.vlgmr.msra.gmra.mxu0 %v1927_v5  ;;  %v4451_v5 = vld [vmem:[%s5815_s4 + $0x94] ss:$8 sps:$4 sm:$0xff]  }
 0x5d5   :  { %2642 = vmatpush1.bf16.msra.mxu0 %v4407_v57  ;;  %v4459_v57 = vld [vmem:[%s5816_s5 + $0x68] sm:$0xff]  }
 0x5d6   :  { %2643 = vmatprep.subr.bf16.mxu0 %v4412_v33  ;;  %v4461_v33 = vld [vmem:[%s5816_s5 + $0x60] sm:$0xff]  }
 0x5d9   :  { %2644 = vmatpush1.bf16.msra.mxu0 %v4410_v34  ;;  %v4462_v34 = vld [vmem:[%s5816_s5 + $0x20] sm:$0xff]  }
 0x5da   :  { %2645 = vmatprep.subr.bf16.mxu0 %v4415_v36  ;;  %v4463_v36 = vld [vmem:[%s5816_s5 + $0x58] sm:$0xff]  }
 0x5dd   :  { %2646 = vmatpush1.bf16.msra.mxu0 %v4413_v37  ;;  %v4464_v37 = vld [vmem:[%s5816_s5 + $0x18] sm:$0xff]  }
 0x5de   :  { %2647 = vmatprep.subr.bf16.mxu0 %v4418_v38  ;;  %v4465_v38 = vld [vmem:[%s5816_s5 + $0x50] sm:$0xff]  }
 0x5e1   :  { %2648 = vmatpush1.bf16.msra.mxu0 %v4416_v9  ;;  %v2216_v9 = vld [vmem:[%s5813_s7 + $0xe] sm:$0x3] }
 0x5e2   :  { %2649 = vmatprep.subr.bf16.mxu0 %v4421_v40 }
 0x5e5   :  { %2650 = vmatpush1.bf16.msra.mxu0 %v4419_v41  ;;  %v2225_v41 = vrot.slane %v2216_v9, %v4621_v28 }
 0x5e6   :  { %2651 = vmatprep.subr.bf16.mxu0 %v4424_v43  ;;  %v2221_v43 = vrot.slane %v2216_v9, %v4624_v29 }
 0x5e9   :  { %2652 = vmatpush1.bf16.msra.mxu0 %v4422_v45 }
 0x5ea   :  { %2653 = vmatprep.subr.bf16.mxu0 %v4427_v48 }
 0x5ed   :  { %2654 = vmatpush1.bf16.msra.mxu0 %v4425_v44 }
 0x5ee   :  { %2655 = vmatprep.subr.bf16.mxu0 %v4430_v49 }
 0x5f1   :  { %2656 = vmatpush1.bf16.msra.mxu0 %v4428_v50 }
 0x5f2   :  { %2657 = vmatprep.subr.bf16.mxu0 %v4433_v42 }
 0x5f5   :  { %2658 = vmatpush2.bf16.msra.mxu0 %v4431_v54 }
 0x5f6   :  { %2659 = vmatprep.subr.bf16.mxu0 %v4436_v56 }
 0x5f9   :  { %2660 = vmatpush2.bf16.msra.mxu0 %v4434_v25 }
 0x5fa   :  { %2661 = vmatprep.subr.bf16.mxu0 %v4439_v58 }
 0x5fd   :  { %2662 = vmatpush2.bf16.msra.mxu0 %v4437_v60 }
 0x5fe   :  { %2663 = vmatprep.subr.bf16.mxu0 %v4442_v62 }
 0x601   :  { %2664 = vmatpush2.bf16.msra.mxu0 %v4440_v0 }
 0x602   :  { %2665 = vmatprep.subr.bf16.mxu0 %v4445_v1 }
 0x605   :  { %2666 = vmatpush2.bf16.msra.mxu0 %v4443_v55 }
 0x606   :  { %2667 = vmatprep.subr.bf16.mxu0 %v4448_v18 }
 0x609   :  { %2668 = vmatpush2.bf16.msra.mxu0 %v4446_v23  ;;  %v4473_v23 = vld [vmem:[%s5816_s5 + $0xf0] sm:$0xff]  }
 0x60a   :  { %2669 = vmatprep.subr.bf16.mxu0 %v4451_v5  ;;  %v4476_v5 = vld [vmem:[%s5816_s5 + $0xa8] sm:$0xff]  }
 0x60d   :  { %2670 = vmatpush2.bf16.msra.mxu0 %v4449_v19  ;;  %v4477_v19 = vld [vmem:[%s5816_s5 + $0xe0] sm:$0xff]  }
 0x694   :  { %v2168_v53 = vpop.f32.mrf.mxu0 }
 0x695   :  { %v2169_v20 = vadd.f32 %v2168_v53, %v1967_v52 }
 0x696   :  { %v2170_v3 = vpop.f32.mrf.mxu0 }
 0x697   :  { %v2171_v6 = vadd.f32 %v2170_v3, %v1971_v2  ;;  %v2177_v13 = vmax.f32 %v2169_v20, 0.0  ;;  %v4468_v3 = vld [vmem:[%s5816_s5 + $0x8] sm:$0xff]   ;;  %v4487_v20 = vld [vmem:[%s5814_s6 + $0x78] sm:$0xff]  }
 0x698   :  { %v2172_v4 = vpop.f32.mrf.mxu0 }
 0x699   :  { %v2173_v32 = vadd.f32 %v2172_v4, %v1967_v52  ;;  %v2178_v16 = vmax.f32 %v2171_v6, 0.0  ;;  %v4467_v52 = vld [vmem:[%s5816_s5 + $0x48] sm:$0xff]   ;;  %v4469_v4 = vld [vmem:[%s5816_s5 + $0x40] sm:$0xff]  }
 0x69a   :  { %v2174_v7 = vpop.f32.mrf.mxu0  ;;  %v4470_v6 = vld [vmem:[%s5816_s5] sm:$0xff]  }
 0x69b   :  { %v2175_v8 = vadd.f32 %v2174_v7, %v1971_v2  ;;  %v2179_v10 = vmax.f32 %v2173_v32, 0.0  ;;  %v4466_v2 = vld [vmem:[%s5816_s5 + $0x10] sm:$0xff]   ;;  %v4471_v32 = vld [vmem:[%s5816_s5 + $0xf8] sm:$0xff]  }
 0x69c   :  { %v4488_v7 = vld [vmem:[%s5814_s6 + $0x70] sm:$0xff]  }
 0x69d   :  { %v2180_v11 = vmax.f32 %v2175_v8, 0.0  ;;  %v2181_v39 = vpack.c.bf16 %v2179_v10, %v2177_v13  ;;  %v4489_v8 = vld [vmem:[%s5814_s6 + $0x68] sm:$0xff]   ;;  %v4490_v10 = vld [vmem:[%s5814_s6 + $0x60] sm:$0xff]  }
 0x69f   :  { %v2182_v46 = vpack.c.bf16 %v2180_v11, %v2178_v16  ;;  %v2469_v11 = vld [vmem:[%s5813_s7 + $0x10] sm:$0x3] }
 0x6a1   :  { %2420 = vmatprep.mubr.bf16.mxu1 %v2182_v46  ;;  %v2478_v46 = vrot.slane %v2469_v11, %v4621_v28  ;;  %v4474_v28 = vld [vmem:[%s5816_s5 + $0xb0] sm:$0xff]  }
 0x6a2   :  { %2421 = vmatmul.mubr.bf16.vlgmr.msra.gmra.mxu1 %v2181_v39 }
 0x6a3   :  { %3945 = vmatpush3.bf16.msra.mxu1 %v4399_v35  ;;  %3960 = vmatprep.mubr.msk.bf16.mxu1 %vm4516_vm10, %v4515_v30  ;;  %v2474_v35 = vrot.slane %v2469_v11, %v4624_v29  ;;  %v4475_v29 = vld [vmem:[%s5816_s5 + $0xe8] sm:$0xff]  }
 0x6a4   :  { %3946 = vmatprep.subr.bf16.mxu1 %v4515_v30 }
 0x6a7   :  { %3947 = vmatpush3.bf16.msra.mxu1 %v4400_v47 }
 0x6a8   :  { %3948 = vmatprep.subr.bf16.mxu1 %v4515_v30 }
 0x6ab   :  { %3949 = vmatpush3.bf16.msra.mxu1 %v4401_v59 }
 0x6ac   :  { %3950 = vmatprep.subr.bf16.mxu1 %v4515_v30 }
 0x6af   :  { %3951 = vmatpush3.bf16.msra.mxu1 %v4402_v61 }
 0x6b0   :  { %3952 = vmatprep.subr.bf16.mxu1 %v4515_v30 }
 0x6b3   :  { %3953 = vmatpush3.bf16.msra.mxu1 %v4403_v14 }
 0x6b4   :  { %3954 = vmatprep.subr.bf16.mxu1 %v4515_v30 }
 0x6b7   :  { %3955 = vmatpush3.bf16.msra.mxu1 %v4404_v63 }
 0x6b8   :  { %3956 = vmatprep.subr.bf16.mxu1 %v4515_v30 }
 0x6bb   :  { %3957 = vmatpush3.bf16.msra.mxu1 %v4405_v15 }
 0x6bc   :  { %3958 = vmatprep.subr.bf16.mxu1 %v4515_v30 }
 0x6bf   :  { %3959 = vmatpush3.bf16.msra.mxu1 %v4406_v17  ;;  %v4472_v17 = vld [vmem:[%s5816_s5 + $0xb8] sm:$0xff]  }
 0x6c0   :  { %3891 = vmatprep.subr.bf16.mxu1 %v4455_v22  ;;  %v4480_v22 = vld [vmem:[%s5816_s5 + $0x98] sm:$0xff]  }
 0x6c2   :  { %3961 = vmatmul.mubr.bf16.vlgmr.msra.gmra.mxu1 %v4837_v12  ;;  %v4454_v12 = vld [vmem:[%s5815_s4 + $0x84] ss:$8 sps:$4 sm:$0xff]  }
 0x6c3   :  { %2671 = vmatprep.subr.bf16.mxu0 %v4454_v12  ;;  %3892 = vmatpush3.bf16.msra.mxu1 %v4456_v24  ;;  %v4478_v12 = vld [vmem:[%s5816_s5 + $0xa0] sm:$0xff]   ;;  %v4481_v24 = vld [vmem:[%s5816_s5 + $0xd0] sm:$0xff]  }
 0x6c4   :  { %2672 = vmatpush2.bf16.msra.mxu0 %v4452_v21  ;;  %3893 = vmatprep.subr.bf16.mxu1 %v4457_v26  ;;  %v4479_v21 = vld [vmem:[%s5816_s5 + $0xd8] sm:$0xff]   ;;  %v4482_v26 = vld [vmem:[%s5816_s5 + $0x90] sm:$0xff]  }
 0x6c5   :  { %3964 = vmatprep.subr.bf16.mxu0 %v4515_v30 }
 0x6c7   :  { %3894 = vmatpush3.bf16.msra.mxu1 %v4458_v27  ;;  %v4483_v27 = vld [vmem:[%s5816_s5 + $0xc8] sm:$0xff]  }
 0x6c8   :  { %3895 = vmatprep.subr.bf16.mxu1 %v4459_v57  ;;  %v4484_v57 = vld [vmem:[%s5816_s5 + $0x88] sm:$0xff]  }
 0x6cb   :  { %3896 = vmatpush3.bf16.msra.mxu1 %v4460_v31  ;;  %v4485_v31 = vld [vmem:[%s5816_s5 + $0xc0] sm:$0xff]  }
 0x6cc   :  { %3897 = vmatprep.subr.bf16.mxu1 %v4461_v33  ;;  %v4486_v33 = vld [vmem:[%s5816_s5 + $0x80] sm:$0xff]  }
 0x6cf   :  { %3898 = vmatpush3.bf16.msra.mxu1 %v4462_v34  ;;  %v4491_v34 = vld [vmem:[%s5814_s6 + $0x58] sm:$0xff]  }
 0x6d0   :  { %3899 = vmatprep.subr.bf16.mxu1 %v4463_v36  ;;  %v4492_v36 = vld [vmem:[%s5814_s6 + $0x50] sm:$0xff]  }
 0x6d3   :  { %3900 = vmatpush3.bf16.msra.mxu1 %v4464_v37  ;;  %v4493_v37 = vld [vmem:[%s5814_s6 + $0x48] sm:$0xff]  }
 0x6d4   :  { %3901 = vmatprep.subr.bf16.mxu1 %v4465_v38  ;;  %v4494_v38 = vld [vmem:[%s5814_s6 + $0x40] sm:$0xff]  }
 0x6d7   :  { %3902 = vmatpush3.bf16.msra.mxu1 %v4466_v2 }
 0x6d8   :  { %3903 = vmatprep.subr.bf16.mxu1 %v4467_v52 }
 0x6db   :  { %3904 = vmatpush3.bf16.msra.mxu1 %v4468_v3  ;;  %v3872_v3 = vld [vmem:[%s5813_s7 + $0x13] ss:$0 sm:$0xff] }
 0x6dc   :  { %3905 = vmatprep.subr.bf16.mxu1 %v4469_v4 }
 0x6df   :  { %3906 = vmatpush3.bf16.msra.mxu1 %v4470_v6 }
 0x6e0   :  { %3922 = vmatprep.subr.bf16.mxu1 %v4471_v32 }
 0x762   :  { %v2422_v40 = vpop.f32.mrf.mxu1 }
 0x763   :  { %v2423_v50 = vadd.f32 %v2422_v40, %v2221_v43 }
 0x764   :  { %v2424_v45 = vpop.f32.mrf.mxu1 }
 0x765   :  { %v2425_v44 = vadd.f32 %v2424_v45, %v2225_v41  ;;  %v2431_v60 = vmax.f32 %v2423_v50, 0.0 }
 0x766   :  { %v2426_v48 = vpop.f32.mrf.mxu1 }
 0x767   :  { %v2427_v49 = vadd.f32 %v2426_v48, %v2221_v43  ;;  %v2432_v25 = vmax.f32 %v2425_v44, 0.0  ;;  %v3799_v48 = vld [vmem:[%s5813_s7 + $0x12] ss:$0 sm:$0xff] }
 0x768   :  { %v2428_v42 = vpop.f32.mrf.mxu1 }
 0x769   :  { %v2429_v54 = vadd.f32 %v2428_v42, %v2225_v41  ;;  %v2433_v56 = vmax.f32 %v2427_v49, 0.0 }
 0x76b   :  { %v2434_v58 = vmax.f32 %v2429_v54, 0.0  ;;  %v5689_v0 = vpack.c.bf16 %v2433_v56, %v2431_v60 }
 0x76d   :  { %v2436_v62 = vpack.c.bf16 %v2434_v58, %v2432_v25 }
 0x76f   :  { %2673 = vmatprep.mubr.bf16.mxu0 %v2436_v62 }
 0x770   :  { %2674 = vmatmul.mubr.bf16.vlgmr.msra.gmra.mxu0 %v5689_v0 }
 0x771   :  { %3980 = vmatprep.mubr.msk.bf16.mxu0 %vm4516_vm10, %v4515_v30  ;;  %3965 = vmatpush3.bf16.msra.mxu0 %v4487_v20 }
 0x772   :  { %3966 = vmatprep.subr.bf16.mxu0 %v4515_v30 }
 0x775   :  { %3967 = vmatpush3.bf16.msra.mxu0 %v4488_v7 }
 0x776   :  { %3968 = vmatprep.subr.bf16.mxu0 %v4515_v30 }
 0x779   :  { %3969 = vmatpush3.bf16.msra.mxu0 %v4489_v8 }
 0x77a   :  { %3970 = vmatprep.subr.bf16.mxu0 %v4515_v30 }
 0x77d   :  { %3971 = vmatpush3.bf16.msra.mxu0 %v4490_v10 }
 0x77e   :  { %3972 = vmatprep.subr.bf16.mxu0 %v4515_v30 }
 0x781   :  { %3973 = vmatpush3.bf16.msra.mxu0 %v4491_v34 }
 0x782   :  { %v5694_v1 = vpop.f32.mrf.mxu1  ;;  %3974 = vmatprep.subr.bf16.mxu0 %v4515_v30 }
 0x784   :  { %v3962_v55 = vpop.f32.mrf.mxu1 }
 0x785   :  { %3975 = vmatpush3.bf16.msra.mxu0 %v4492_v36 }
 0x786   :  { %v5696_v51 = vpop.f32.mrf.mxu1  ;;  %3976 = vmatprep.subr.bf16.mxu0 %v4515_v30 }
 0x788   :  { %v3963_v53 = vpop.f32.mrf.mxu1 }
 0x789   :  { %3977 = vmatpush3.bf16.msra.mxu0 %v4493_v37 }
 0x78a   :  { %3978 = vmatprep.subr.bf16.mxu0 %v4515_v30 }
 0x78d   :  { %3979 = vmatpush3.bf16.msra.mxu0 %v4494_v38 }
 0x830   :  { %v2675_v16 = vpop.f32.mrf.mxu0 }
 0x831   :  { %v2676_v63 = vadd.f32 %v2675_v16, %v2474_v35 }
 0x832   :  { %v2677_v13 = vpop.f32.mrf.mxu0 }
 0x833   :  { %v2678_v61 = vadd.f32 %v2677_v13, %v2478_v46 }
 0x834   :  { %v2679_v39 = vpop.f32.mrf.mxu0 }
 0x835   :  { %v2680_v47 = vadd.f32 %v2679_v39, %v2474_v35 }
 0x836   :  { %v2681_v59 = vpop.f32.mrf.mxu0 }
 0x837   :  { %v2682_v14 = vadd.f32 %v2681_v59, %v2478_v46  ;;  %v2684_v18 = vpack.c.bf16 %v2680_v47, %v2676_v63 }
 0x839   :  { %v2685_v15 = vpack.c.bf16 %v2682_v14, %v2678_v61 }
 0x83b   :  { %2951 = vmatprep.mubr.bf16.mxu1 %v2685_v15 }
 0x83c   :  { %2952 = vmatmul.mubr.bf16.vlgmr.msra.gmra.mxu1 %v2684_v18 }
 0x83d   :  { %3923 = vmatpush3.bf16.msra.mxu1 %v4472_v17  ;;  %3239 = vmatprep.mubr.bf16.mxu1 %v2436_v62 }
 0x83e   :  { %3924 = vmatprep.subr.bf16.mxu1 %v4473_v23 }
 0x841   :  { %3925 = vmatpush3.bf16.msra.mxu1 %v4474_v28 }
 0x842   :  { %3926 = vmatprep.subr.bf16.mxu1 %v4475_v29 }
 0x845   :  { %3927 = vmatpush3.bf16.msra.mxu1 %v4476_v5 }
 0x846   :  { %3928 = vmatprep.subr.bf16.mxu1 %v4477_v19 }
 0x849   :  { %3929 = vmatpush3.bf16.msra.mxu1 %v4478_v12 }
 0x84a   :  { %3930 = vmatprep.subr.bf16.mxu1 %v4479_v21 }
 0x84d   :  { %3931 = vmatpush3.bf16.msra.mxu1 %v4480_v22 }
 0x84e   :  { %3932 = vmatprep.subr.bf16.mxu1 %v4481_v24 }
 0x851   :  { %3933 = vmatpush3.bf16.msra.mxu1 %v4482_v26 }
 0x852   :  { %3934 = vmatprep.subr.bf16.mxu1 %v4483_v27 }
 0x855   :  { %3935 = vmatpush3.bf16.msra.mxu1 %v4484_v57 }
 0x856   :  { %3936 = vmatprep.subr.bf16.mxu1 %v4485_v31 }
 0x859   :  { %3937 = vmatpush3.bf16.msra.mxu1 %v4486_v33 }
 0x85c   :  { %3240 = vmatmul.mubr.bf16.vlgmr.msra.gmra.mxu1 %v5689_v0 }
 0x8fc   :  { %v3907_v9 = vpop.f32.mrf.mxu1 }
 0x8fe   :  { %v3908_v40 = vpop.f32.mrf.mxu1 }
 0x8ff   :  { %v3909_v41 = vadd.f32 %v3908_v40, %v3907_v9 }
 0x900   :  { %v3910_v43 = vpop.f32.mrf.mxu1 }
 0x901   :  { %v2954_v45 = vadd.f32 %v3909_v41, %v5694_v1 }
 0x902   :  { %v3911_v44 = vpop.f32.mrf.mxu1 }
 0x903   :  { %v3912_v49 = vadd.f32 %v3911_v44, %v3910_v43  ;;  %v2967_v50 = vadd.f32 %v3799_v48, %v2954_v45 }
 0x905   :  { %v2957_v30 = vadd.f32 %v3912_v49, %v5696_v51  ;;  %v2969_v54 = vmax.f32 %v2967_v50, 0.0 }
 0x907   :  { %v2968_v42 = vadd.f32 %v3799_v48, %v2957_v30 }
 0x909   :  { %v2970_v56 = vmax.f32 %v2968_v42, 0.0 }
 0x90b   :  { %v2971_v25 = vpack.c.bf16 %v2970_v56, %v2969_v54 }
 0x90d   :  { %3981 = vmatmul.mubr.bf16.vlgmr.msra.gmra.mxu0 %v2971_v25 }
 0x91c   :  { %v3938_v58 = vpop.f32.mrf.mxu1 }
 0x91e   :  { %v3939_v60 = vpop.f32.mrf.mxu1 }
 0x91f   :  { %v3940_v1 = vadd.f32 %v3939_v60, %v3938_v58 }
 0x920   :  { %v3941_v62 = vpop.f32.mrf.mxu1 }
 0x922   :  { %v3942_v0 = vpop.f32.mrf.mxu1 }
 0x923   :  { %v3943_v2 = vadd.f32 %v3942_v0, %v3941_v62 }
 0x9cd   :  { %v3104_v55 = vpop.f32.mrf.mxu0 }
 0x9ce   :  { %v3242_v52 = vadd.f32 %v3940_v1, %v3104_v55 }
 0x9cf   :  { %v3982_v53 = vpop.f32.mrf.mxu0 }
 0x9d0   :  { %v3255_v32 = vadd.f32 %v3872_v3, %v3242_v52 }
 0x9d1   :  { %v3107_v4 = vpop.f32.mrf.mxu0 }
 0x9d2   :  { %v3245_v51 = vadd.f32 %v3943_v2, %v3107_v4 }
 0x9d3   :  { %v3983_v6 = vpop.f32.mrf.mxu0 }
 0x9d4   :  { %v3256_v20 = vadd.f32 %v3872_v3, %v3245_v51 }
 0x9d6   :  { %v3880_v7 = vpack.c.bf16 %v3256_v20, %v3255_v32 }
 0x9d8   :  { %3881 = vst [vmem:[%s5817_s8] sm:$0xff] %v3880_v7  }

</bundles_post_ra>
